<compile_context>
chip_gen: v7x
topology: tpu7x:2x2x1
jax: 0.10.0
libtpu: 0.0.40
codegen_flags: <defaults>
</compile_context>

<pallas_src>
import jax
import jax.numpy as jnp
from jax import lax
from jax.experimental import pallas as pl
from jax.experimental.pallas import tpu as pltpu

IN_FEATURES = 64 * 64 * 64   # 262144, hard-coded by the module
OUT_FEATURES = 2

TK = 32768                   # K tile (multiple of 128 lanes); 262144 / 32768 = 8 tiles
N_SPLIT = 2                  # leading "parallel" axis: split the K stream in half
K_HALF = IN_FEATURES // N_SPLIT          # 131072
STEPS_PER_SPLIT = K_HALF // TK           # 4 grid steps per split


def _linear_kernel(x_ref, w_ref, o_ref):
    """One K-tile of the partial product y[c] += x_tile @ w_tile^T.

    x_ref : (B, TK)   VMEM  -- K tile of the flattened input
    w_ref : (N, TK)   VMEM  -- K tile of the weight in native lane-dense (N, K) layout
    o_ref : (B, N)    VMEM  -- partial output for split c (resident across k, f32)
    """
    k = pl.program_id(1)

    @pl.when(k == 0)
    def _():
        o_ref[...] = jnp.zeros_like(o_ref)

    # Contract the K (lane) axis of both operands: (B, TK) x (N, TK) -> (B, N).
    o_ref[...] += lax.dot_general(
        x_ref[...], w_ref[...],
        dimension_numbers=(((1,), (1,)), ((), ())),
        preferred_element_type=jnp.float32,
    )


def test_classifier_forward(x, weight, bias):
    """x: (B, 64, 64, 64).  weight: (OUT, IN) (PyTorch layout).  bias: (OUT,)."""
    B = x.shape[0]
    x2d = x.reshape(B, IN_FEATURES)       # glue: flatten (plain JAX)

    partials = pl.pallas_call(
        _linear_kernel,
        out_shape=jax.ShapeDtypeStruct((N_SPLIT, B, OUT_FEATURES), jnp.float32),
        grid_spec=pltpu.PrefetchScalarGridSpec(
            num_scalar_prefetch=0,
            grid=(N_SPLIT, STEPS_PER_SPLIT),
            in_specs=[
                # x tile: (B, TK) at K-block index c*STEPS_PER_SPLIT + k
                pl.BlockSpec((B, TK),
                             lambda c, k: (0, c * STEPS_PER_SPLIT + k)),
                # weight tile: (N, TK), no transpose -- lane-dense along K
                pl.BlockSpec((OUT_FEATURES, TK),
                             lambda c, k: (0, c * STEPS_PER_SPLIT + k)),
            ],
            # Partial output block for split c; resident across the k axis.
            out_specs=pl.BlockSpec((None, B, OUT_FEATURES),
                                   lambda c, k: (c, 0, 0)),
        ),
        compiler_params=pltpu.CompilerParams(
            dimension_semantics=("parallel", "arbitrary"),
        ),
    )(x2d, weight)

    # Tiny (2, B, 2) reduce + bias add in the wrapper.
    y = partials.sum(axis=0) + bias[None, :]
    return y.astype(x.dtype)


if __name__ == "__main__":
    key = jax.random.PRNGKey(0)
    kx, kw, kb = jax.random.split(key, 3)

    B = 2
    # Input consistent with the module's hard-coded 64*64*64 flatten.
    x = jax.random.normal(kx, (B, 64, 64, 64), dtype=jnp.float32)

    # Deterministic synthetic parameters (PyTorch Linear shapes: (out, in), (out,)).
    bound = 1.0 / (IN_FEATURES ** 0.5)
    weight = jax.random.uniform(
        kw, (OUT_FEATURES, IN_FEATURES), dtype=jnp.float32,
        minval=-bound, maxval=bound)
    bias = jax.random.uniform(
        kb, (OUT_FEATURES,), dtype=jnp.float32, minval=-bound, maxval=bound)

    out = test_classifier_forward(x, weight, bias)
    out = jax.block_until_ready(out)

    # Reference check in plain JAX.
    ref = x.reshape(B, IN_FEATURES) @ weight.T + bias
    assert out.shape == (B, OUT_FEATURES)
    assert jnp.allclose(out, ref, atol=1e-3, rtol=1e-3), (out, ref)

    print("KERNEL_OK")
</pallas_src>

<mosaic_0001>
module attributes {stable_mosaic.version = 11 : i64} {
  func.func @_linear_kernel(%arg0: i32, %arg1: i32, %arg2: memref<2x32768xf32, #tpu.memory_space<vmem>>, %arg3: memref<2x32768xf32, #tpu.memory_space<vmem>>, %arg4: memref<1x2x2xf32, #tpu.memory_space<vmem>>) attributes {dimension_semantics = [#tpu.dimension_semantics<parallel>, #tpu.dimension_semantics<arbitrary>], iteration_bounds = array<i64: 2, 4>, scalar_prefetch = 0 : i64, scratch_operands = 0 : i64, tpu.core_type = #tpu.core_type<tc>, window_params = [{transform_indices = @transform_0, window_bounds = array<i64: 2, 32768>}, {transform_indices = @transform_1, window_bounds = array<i64: 2, 32768>}, {transform_indices = @transform_2, window_bounds = array<i64: 1, 2, 2>}]} {
    %c0_i32 = arith.constant 0 : i32
    %0 = arith.cmpi eq, %arg1, %c0_i32 : i32
    %1 = arith.extui %0 : i1 to i32
    %c0_i32_0 = arith.constant 0 : i32
    %2 = arith.cmpi ne, %1, %c0_i32_0 : i32
    scf.if %2 {
      %cst_10 = arith.constant 0.000000e+00 : f32
      %12 = vector.broadcast %cst_10 : f32 to vector<2x2xf32>
      %c0_11 = arith.constant 0 : index
      %c0_12 = arith.constant 0 : index
      %c0_13 = arith.constant 0 : index
      %13 = vector.load %arg4[%c0_11, %c0_12, %c0_13] : memref<1x2x2xf32, #tpu.memory_space<vmem>>, vector<1x2x2xf32>
      %14 = vector.shape_cast %13 : vector<1x2x2xf32> to vector<2x2xf32>
      %15 = vector.shape_cast %12 : vector<2x2xf32> to vector<1x2x2xf32>
      tpu.vector_store %arg4[%c0_11, %c0_12, %c0_13], %15 {strides = array<i32>} : memref<1x2x2xf32, #tpu.memory_space<vmem>>, vector<1x2x2xf32>,
    } else {
    }
    %c0 = arith.constant 0 : index
    %c0_1 = arith.constant 0 : index
    %c0_2 = arith.constant 0 : index
    %3 = vector.load %arg4[%c0, %c0_1, %c0_2] : memref<1x2x2xf32, #tpu.memory_space<vmem>>, vector<1x2x2xf32>
    %4 = vector.shape_cast %3 : vector<1x2x2xf32> to vector<2x2xf32>
    %c0_3 = arith.constant 0 : index
    %c0_4 = arith.constant 0 : index
    %5 = vector.load %arg2[%c0_3, %c0_4] : memref<2x32768xf32, #tpu.memory_space<vmem>>, vector<2x32768xf32>
    %c0_5 = arith.constant 0 : index
    %c0_6 = arith.constant 0 : index
    %6 = vector.load %arg3[%c0_5, %c0_6] : memref<2x32768xf32, #tpu.memory_space<vmem>>, vector<2x32768xf32>
    %cst = arith.constant dense<0.000000e+00> : vector<2x2xf32>
    %7 = tpu.matmul %5, %6, %cst {dimension_numbers = #tpu.dot_dimension_numbers<[1], [1], [0], [0], [0, 0, 1, 0], [], []>} : vector<2x32768xf32>, vector<2x32768xf32>, vector<2x2xf32> -> vector<2x2xf32>
    %8 = arith.addf %4, %7 : vector<2x2xf32>
    %c0_7 = arith.constant 0 : index
    %c0_8 = arith.constant 0 : index
    %c0_9 = arith.constant 0 : index
    %9 = vector.load %arg4[%c0_7, %c0_8, %c0_9] : memref<1x2x2xf32, #tpu.memory_space<vmem>>, vector<1x2x2xf32>
    %10 = vector.shape_cast %9 : vector<1x2x2xf32> to vector<2x2xf32>
    %11 = vector.shape_cast %8 : vector<2x2xf32> to vector<1x2x2xf32>
    tpu.vector_store %arg4[%c0_7, %c0_8, %c0_9], %11 {strides = array<i32>} : memref<1x2x2xf32, #tpu.memory_space<vmem>>, vector<1x2x2xf32>,
    return
  }
  func.func @transform_0(%arg0: i32, %arg1: i32) -> (i32, i32) {
    %c4_i32 = arith.constant 4 : i32
    %0 = arith.muli %arg0, %c4_i32 : i32
    %1 = arith.addi %0, %arg1 : i32
    %c0_i32 = arith.constant 0 : i32
    %c0_i32_0 = arith.constant 0 : i32
    return %c0_i32, %1 : i32, i32
  }
  func.func @transform_1(%arg0: i32, %arg1: i32) -> (i32, i32) {
    %c4_i32 = arith.constant 4 : i32
    %0 = arith.muli %arg0, %c4_i32 : i32
    %1 = arith.addi %0, %arg1 : i32
    %c0_i32 = arith.constant 0 : i32
    %c0_i32_0 = arith.constant 0 : i32
    return %c0_i32, %1 : i32, i32
  }
  func.func @transform_2(%arg0: i32, %arg1: i32) -> (i32, i32, i32) {
    %c0_i32 = arith.constant 0 : i32
    %c0_i32_0 = arith.constant 0 : i32
    %c0_i32_1 = arith.constant 0 : i32
    return %arg0, %c0_i32, %c0_i32_0 : i32, i32, i32
  }
}

</mosaic_0001>

<bundles_post_ra>
// kernel: tpu_custom_call.1
= control target key start
LH: loop header
LB: loop body
LE: loop exit
PB: predicated region body
PF: predicated region fallthrough
CT: control target
= control target key end

     0   :  { %s13513_s0 = inlined_call_operand.hbm [shape: f32[2,262144], index: 0, kind: input, shape index: {}]   ;;  %s13514_s1 = inlined_call_operand.hbm [shape: f32[2,262144], index: 1, kind: input, shape index: {}]   ;;  %s13515_s2 = inlined_call_operand.hbm [shape: f32[2,2,2], index: 2, kind: output, shape index: {}]  }
   0x1   :  { %13522 = sst [smem:[#allocation13_spill]] %s13513_s0 }
   0x2   :  { %7 = vsyncpa [#allocation3], 0 }
   0x3   :  { %9 = vsyncpa [#allocation3 + $0x1], 0 }
   0x4   :  { %10 = vsyncpa [#allocation6], 0 }
   0x5   :  { %12 = vsyncpa [#allocation6 + $0x1], 0 }
   0x6   :  { %13 = vsyncpa [#allocation4], 0 }
   0x7   :  { %15 = vsyncpa [#allocation4 + $0x1], 0  ;;  %s12736_s9 = smov 0   ;;  %s12738_s10 = smov 0  }
   0x8   :  { %s12740_s11 = smov 0   ;;  %s12742_s12 = smov 0  }
   0x9   :  { %s12744_s13 = smov 0   ;;  %s12746_s14 = smov 0  }
   0xa   :  { %s12748_s15 = smov 0   ;;  %s12750_s16 = smov 0  }
   0xb   :  { %s12752_s17 = smov 0   ;;  %s12754_s18 = smov 0  }
   0xc   :  { %s12756_s19 = smov 0  }
   0xd LB: > { %s12264_s20 = sadd.s32 4294967295, %s12714_s19   ;;  %s12265_s21 = sadd.s32 4294967294, %s12714_s19   ;;  %s12714_s19 = sphi %s12756_s19, %s21_s19   ;;  %s12710_s18 = sphi %s12754_s18, %s13551_s18   ;;  %s12706_s17 = sphi %s12752_s17, %s13550_s17   ;;  %s12702_s16 = sphi %s12750_s16, %s13549_s16   ;;  %s12698_s15 = sphi %s12748_s15, %s13548_s15   ;;  %s12694_s14 = sphi %s12746_s14, %s13547_s14   ;;  %s12690_s13 = sphi %s12744_s13, %s13546_s13   ;;  %s12686_s12 = sphi %s12742_s12, %s13545_s12   ;;  %s12682_s11 = sphi %s12740_s11, %s13544_s11   ;;  %s12678_s10 = sphi %s12738_s10, %s13543_s10   ;;  %s12674_s9 = sphi %s12736_s9, %s13542_s9  }
   0xe   : > { %s30_s22 = sadd.s32 1, %s12706_s17  ;;  %s33_s23 = sadd.s32 1, %s12710_s18 }
   0xf   : > { %p31_p0 = scmp.ge.s32.totalorder %s30_s22, 4  ;;  %s12266_s24 = sshll.u32 %s12710_s18, 2 }
  0x10   : > { %s12795_s25 = sadd.s32 %s12706_s17, %s12266_s24  ;;  %s44_s26 = sadd.s32 1, %s12694_s14 }
  0x11   : > { %s13553_s22 = smov (%p31_p0, %s30_s22), 0  ;;  %s13555_s23 = smov (!%p31_p0, %s33_s23), %s12710_s18 }
  0x12   : > { %13523 = sst [smem:[#allocation11_spill]] %s13553_s22  ;;  %p51_p1 = scmp.ne.s32.totalorder %s12694_s14, %s12690_s13 }
  0x13   : > { %p52_p2 = scmp.eq.s32.totalorder %s12714_s19, 0  ;;  %p35_p3 = scmp.ge.s32.totalorder %s13555_s23, 2 }
  0x14   : > { %p57_p4 = scmp.ne.s32.totalorder %s12690_s13, %s12686_s12  ;;  %p58_p6 = scmp.eq.s32.totalorder %s12264_s20, 0 }
  0x15   : > { %p12805_p5 = por %p52_p2, %p51_p1  ;;  %s13557_s23 = smov (%p35_p3, %s13555_s23), 0 }
  0x16   : > { %13525 = sst [smem:[#allocation12_spill]] %s13557_s23  ;;  %p12811_p7 = por %p58_p6, %p57_p4 }
  0x17   : > { %s100_s29 = sadd.s32 1, %s12682_s11  ;;  %s12267_s30 = sshll.u32 %s13557_s23, 2 }
  0x18   : > { %s13526_s28 = scalar_select %p12811_p7, 1, 0 }
  0x19   : > { %s97_s3 = ssub.s32 %s12710_s18, %s13557_s23  ;;  %s40_s4 = sadd.s32 %s12267_s30, %s13553_s22 }
  0x1a   : > { %p98_p8 = scmp.eq.s32.totalorder %s97_s3, 0  ;;  %s41_s5 = ssub.s32 %s12795_s25, %s40_s4 }
  0x1b   : > { %p110_p9 = scmp.ne.s32.totalorder %s12682_s11, %s12678_s10  ;;  %p42_p10 = scmp.eq.s32.totalorder %s41_s5, 0 }
  0x1c   : > { %p111_p11 = scmp.eq.s32.totalorder %s12264_s20, 7  ;;  %p116_p13 = scmp.ne.s32.totalorder %s12678_s10, %s12674_s9 }
  0x1d   : > { %s12824_s6 = scalar_select %p98_p8, %s12682_s11, %s100_s29  }
  0x1e   : > { %s12827_s7 = scalar_select %p42_p10, %s12694_s14, %s44_s26  }
  0x1f   : > { %p12829_p12 = por %p111_p11, %p110_p9  ;;  %p117_p0 = scmp.eq.s32.totalorder %s12265_s21, 7 }
  0x20   : > { %p12308_p1 = scmp.lt.s32.totalorder %s12714_s19, 8  ;;  %s12839_s12 = sand.u32 1, %s12694_s14  }
  0x21   : > { %s13527_s8 = scalar_select %p12829_p12, 1, 0 }
  0x22   : > { %p12841_p2 = por %p117_p0, %p116_p13  ;;  %s13516_s24 = sshll.u32 %s12839_s12, 9 }
  0x23   : > { %s13517_s26 = sshll.u32 %s12795_s25, 13  ;;  %s13529_s0 = sld [smem:[#allocation13_spill]] }
  0x24   : > { %s13528_s20 = scalar_select %p12841_p2, 1, 0 }
  0x25   : > { %s141_s21 = scalar_lea.vmem [#allocation2], %s13516_s24  ;;  %p12858_p3 = pnand %p12308_p1, %p12805_p5 }
  0x26   : > { %s151_s4 = sshll.u32 %s141_s21, 4  ;;  %s138_s29 = scalar_lea.sflag [#allocation3], %s12839_s12  ;;  %s12862_s4 = int_to_ptr.vmem [resolvable:$true] %s151_s4 }
  0x27   : > { %p12530_p9 = pneg %p12858_p3 }
  0x29   : > { %s12852_s3 = scalar_lea.hbm %s13529_s0, %s13517_s26  ;;  %s12533_s24 = scalar_lea.hbm %s13529_s0, 65536 }
  0x2a   : > { %s12528_s30 = scalar_lea.hbm %s12852_s3, 8192  ;;  %p12534_p5 = scmp.lt.u32.totalorder %s12852_s3, %s13529_s0 }
  0x2b   : > { %p12529_p8 = scmp.ne.s32.totalorder %s12852_s3, %s12528_s30  ;;  %p12535_p13 = scmp.lt.u32.totalorder %s12533_s24, %s12528_s30 }
  0x2c   : > { %p12537_p1 = scmp.lt.u32.totalorder %s12528_s30, %s12852_s3 }
  0x2d   : > { %p12531_p10 = pnand %p12530_p9, %p12529_p8  ;;  %p12536_p0 = por %p12535_p13, %p12534_p5 }
  0x2f   : > { %p12532_p11 = pneg %p12531_p10  ;;  %p12538_p4 = por %p12537_p1, %p12536_p0 }
  0x31   : > { %p12539_p6 = pnand %p12538_p4, %p12532_p11 }
  0x33   : > { %12542 = shalt.err (!%p12539_p6)
}
  0x34   : > { %s12543_s22 = scalar_lea.vmem %s12862_s4, 8192  ;;  %s12716_s27 = smov [#allocation2]  }
  0x35   : > { %p12544_p8 = scmp.ne.s32.totalorder %s12862_s4, %s12543_s22  ;;  %s12548_s21 = sshll.u32 %s12716_s27, 4  ;;  %s12549_s21 = int_to_ptr.vmem [resolvable:$false] %s12548_s21 }
  0x36   : > { %s12550_s23 = scalar_lea.vmem %s12549_s21, 16384  ;;  %p12551_p12 = scmp.lt.s32.totalorder %s12862_s4, %s12549_s21 }
  0x37   : > { %p12546_p10 = pnand %p12544_p8, %p12530_p9  ;;  %p12552_p5 = scmp.lt.s32.totalorder %s12550_s23, %s12543_s22 }
  0x39   : > { %p12547_p2 = pneg %p12546_p10  ;;  %p12553_p13 = por %p12552_p5, %p12551_p12 }
  0x3b   : > { %p12554_p0 = pnand %p12553_p13, %p12547_p2 }
  0x3d   : > { %12557 = shalt.err (!%p12554_p0)
}
  0x3e   : > { %12300 = dma.hbm_to_vmem [thread:$0]  (!%p12858_p3), %s12852_s3, 8192, %s12862_s4, %s138_s29  }
  0x3f   : > { %p13531_p4 = scmp.lt.s32.totalorder %s12714_s19, 9  ;;  %p13532_p6 = scmp.ge.s32.totalorder %s12714_s19, 1 }
  0x40   : > { %s13534_s22 = sshll.u32 %s12795_s25, 13  ;;  %s13535_s21 = sshll.u32 %s12839_s12, 9 }
  0x41   : > { %p12896_p11 = pnand %p13532_p6, %p13531_p4  ;;  %s12905_s27 = scalar_lea.hbm %s13514_s1, %s13534_s22 }
  0x42   : > { %s162_s23 = scalar_lea.vmem [#allocation5], %s13535_s21  ;;  %s159_s3 = scalar_lea.sflag [#allocation6], %s12839_s12 }
  0x43   : > { %s13533_s24 = scalar_select %p12896_p11, 1, 0 }
  0x44   : > { %s172_s0 = sshll.u32 %s162_s23, 4  ;;  %s12558_s4 = scalar_lea.hbm %s12905_s27, 8192  ;;  %s173_s0 = int_to_ptr.vmem [resolvable:$true] %s172_s0 }
  0x45   : > { %p12559_p12 = scmp.ne.s32.totalorder %s12905_s27, %s12558_s4  ;;  %s12563_s22 = scalar_lea.hbm %s13514_s1, 65536 }
  0x46   : > { %p12564_p8 = scmp.lt.u32.totalorder %s12905_s27, %s13514_s1  ;;  %p12565_p10 = scmp.lt.u32.totalorder %s12563_s22, %s12558_s4 }
  0x47   : > { %p12561_p2 = pnand %p12559_p12, %p12530_p9  ;;  %p12567_p13 = scmp.lt.u32.totalorder %s12558_s4, %s12905_s27 }
  0x48   : > { %p12566_p5 = por %p12565_p10, %p12564_p8 }
  0x49   : > { %p12562_p1 = pneg %p12561_p2 }
  0x4a   : > { %p12568_p0 = por %p12567_p13, %p12566_p5 }
  0x4c   : > { %p12569_p4 = pnand %p12568_p0, %p12562_p1 }
  0x4e   : > { %12572 = shalt.err (!%p12569_p4)
}
  0x4f   : > { %s12573_s12 = scalar_lea.vmem %s173_s0, 8192  ;;  %s12717_s21 = smov [#allocation5]  }
  0x50   : > { %p12574_p6 = scmp.ne.s32.totalorder %s173_s0, %s12573_s12  ;;  %s12578_s23 = sshll.u32 %s12717_s21, 4  ;;  %s12579_s23 = int_to_ptr.vmem [resolvable:$false] %s12578_s23 }
  0x51   : > { %s12580_s25 = scalar_lea.vmem %s12579_s23, 16384  ;;  %p12581_p7 = scmp.lt.s32.totalorder %s173_s0, %s12579_s23 }
  0x52   : > { %p12576_p12 = pnand %p12574_p6, %p12530_p9  ;;  %p12582_p11 = scmp.lt.s32.totalorder %s12580_s25, %s12573_s12 }
  0x54   : > { %p12577_p2 = pneg %p12576_p12  ;;  %p12583_p8 = por %p12582_p11, %p12581_p7 }
  0x56   : > { %p12584_p10 = pnand %p12583_p8, %p12577_p2 }
  0x58   : > { %12587 = shalt.err (!%p12584_p10)
}
  0x59   : > { %12303 = dma.hbm_to_vmem [thread:$0]  (!%p12858_p3), %s12905_s27, 8192, %s173_s0, %s159_s3  }
  0x5a   : > { %p13536_p1 = scmp.ne.s32.totalorder %s13533_s24, 0 }
  0x5b   : > { %s183_s4 = sand.u32 (!%p13536_p1), 1, %s12690_s13   ;;  %p13537_p9 = scmp.ne.s32.totalorder (!%p13536_p1), %s13526_s28, 0 }
  0x5c   : > { %181 = sbr.rel (%p13536_p1) target bundleno = 610 (0x262), region = 28  ;;  %s12281_s29 = sshll.u32 (!%p13536_p1), %s183_s4, 9 }
  0x5d   : > { %s184_s22 = scalar_lea.sflag (!%p13536_p1), [#allocation3], %s183_s4  ;;  %s12932_s26 = scalar_lea.vmem (!%p13536_p1), [#allocation2], %s12281_s29 }
  0x63   : > { %12661 = dma.done.wait (%p13537_p9), %s184_s22, 8192  }
  0x64   : > { %12663 = vsyncadd (%p13537_p9), %s184_s22, 4294959104  ;;  %s193_s30 = scalar_lea.sflag [#allocation6], %s183_s4  ;;  %s12938_s5 = scalar_lea.vmem [#allocation5], %s12281_s29 }
  0x65   : > { %12665 = dma.done.wait (%p13537_p9), %s193_s30, 8192  }
  0x66   : > { %12667 = vsyncadd (%p13537_p9), %s193_s30, 4294959104  ;;  %s219_s0 = sand.u32 1, %s12678_s10   ;;  %p12284_p7 = scmp.ne.s32.totalorder %s12698_s15, 0 }
  0x67   : > { %s12283_s24 = sshll.u32 %s219_s0, 1  ;;  %vm232_vm0 = vcmask (!%p12284_p7), 9216   ;;  %v12718_v0 = vmov (!%p12284_p7), 0.0  }
  0x68   : > { %s12947_s27 = scalar_lea.vmem [#allocation7], %s12283_s24  ;;  %231 = sbr.rel (%p12284_p7) target bundleno = 111 (0x6f), region = 40 }
  0x69   : > { %233 = vst.msk [vmem:[%s12947_s27] sm:$0x3] (!%p12284_p7), %vm232_vm0, %v12718_v0 }
  0x6f PF: > { %v299_v1 = vld [vmem:[%s12938_s5] sm:$0xff]  ;;  %v431_v2 = vlaneseq  ;;  %v12719_v4 = vmov 1983009808   ;;  %v300_v6 = vld [vmem:[%s12938_s5 + $0x8] sm:$0xff]  ;;  %v301_v12 = vld [vmem:[%s12938_s5 + $0x10] sm:$0xff]  ;;  %s12286_s15 = sshll.u32 %s12702_s16, 5 }
  0x70   : > { %v235_v3 = vld [vmem:[%s12932_s26] sm:$0xff]  ;;  %v429_v5 = vunpack.c.l.s4 %v12719_v4  ;;  %v1835_v9 = vcombine.high %v299_v1, %v299_v1  ;;  %v236_v11 = vld [vmem:[%s12932_s26 + $0x8] sm:$0xff]  ;;  %v1852_v13 = vcombine.high %v300_v6, %v300_v6  ;;  %v1869_v16 = vcombine.high %v301_v12, %v301_v12  ;;  %v237_v21 = vld [vmem:[%s12932_s26 + $0x10] sm:$0xff]  ;;  %s12156_s28 = sshll.u32 %s12947_s27, 4  ;;  %s13448_s21 = scalar_lea.hbm %s13515_s2, %s12286_s15  ;;  %s13450_s28 = int_to_ptr.vmem [resolvable:$true] %s12156_s28 }
  0x71   : > { %v432_v7 = vshrl.u32 %v431_v2, 7  ;;  %v427_v10 = vcombine.high %v235_v3, %v235_v3  ;;  %v444_v15 = vcombine.high %v236_v11, %v236_v11  ;;  %v302_v26 = vld [vmem:[%s12938_s5 + $0x18] sm:$0xff]  ;;  %v461_v34 = vcombine.high %v237_v21, %v237_v21  ;;  %v303_v39 = vld [vmem:[%s12938_s5 + $0x20] sm:$0xff]  ;;  %v304_v50 = vld [vmem:[%s12938_s5 + $0x28] sm:$0xff]  ;;  %s12143_s23 = scalar_lea.sflag [#allocation4], %s219_s0  ;;  %s12588_s25 = scalar_lea.vmem %s13450_s28, 32 }
  0x72   : > { %v430_v8 = vunpack.c.0.s8 %v429_v5  ;;  %v238_v31 = vld [vmem:[%s12932_s26 + $0x18] sm:$0xff]  ;;  %v1886_v37 = vcombine.high %v302_v26, %v302_v26  ;;  %v239_v44 = vld [vmem:[%s12932_s26 + $0x20] sm:$0xff]  ;;  %v1903_v49 = vcombine.high %v303_v39, %v303_v39  ;;  %v240_v55 = vld [vmem:[%s12932_s26 + $0x28] sm:$0xff]  ;;  %v1920_v61 = vcombine.high %v304_v50, %v304_v50  ;;  %p12589_p3 = scmp.ne.s32.totalorder %s13450_s28, %s12588_s25  ;;  %p13538_p11 = scmp.ne.s32.totalorder %s13527_s8, 0 }
  0x73   : > { %v478_v40 = vcombine.high %v238_v31, %v238_v31  ;;  %v495_v51 = vcombine.high %v239_v44, %v239_v44  ;;  %v305_v62 = vld [vmem:[%s12938_s5 + $0x30] sm:$0xff]  ;;  %v512_v63 = vcombine.high %v240_v55, %v240_v55  ;;  %vm12140_vm1 = vcmask 9216   ;;  %s12720_s16 = smov [#allocation7]  }
  0x74   : > { %v12956_v14 = vsub.s32 %v430_v8, %v432_v7  ;;  %p12590_p5 = pnand %p12589_p3, %p13538_p11  ;;  %s12592_s4 = sshll.u32 %s12720_s16, 4  ;;  %s12593_s4 = int_to_ptr.vmem [resolvable:$false] %s12592_s4 }
  0x75   : > { %s12594_s29 = scalar_lea.vmem %s12593_s4, 64  ;;  %p12595_p0 = scmp.lt.s32.totalorder %s13450_s28, %s12593_s4 }
  0x76   : > { %v1842_v17 = vrot.slane %v299_v1, %v12956_v14  ;;  %v1849_v18 = vrot.slane %v1835_v9, %v12956_v14  ;;  %v434_v19 = vrot.slane %v235_v3, %v12956_v14  ;;  %v441_v20 = vrot.slane %v427_v10, %v12956_v14  ;;  %v241_v3 = vld [vmem:[%s12932_s26 + $0x30] sm:$0xff]  ;;  %v306_v10 = vld [vmem:[%s12938_s5 + $0x38] sm:$0xff]  ;;  %p12591_p13 = pneg %p12590_p5  ;;  %p12596_p4 = scmp.lt.s32.totalorder %s12594_s29, %s12588_s25 }
  0x77   : > { %v1859_v22 = vrot.slane %v300_v6, %v12956_v14  ;;  %v1866_v23 = vrot.slane %v1852_v13, %v12956_v14  ;;  %v451_v24 = vrot.slane %v236_v11, %v12956_v14  ;;  %v1876_v25 = vrot.slane %v301_v12, %v12956_v14 }
  0x78   : > { %v1850_v27 = vcombine.high %v1842_v17, %v1842_v17  ;;  %v1851_v28 = vcombine.high %v1849_v18, %v1849_v18  ;;  %v442_v29 = vcombine.high %v434_v19, %v434_v19  ;;  %v443_v30 = vcombine.high %v441_v20, %v441_v20  ;;  %p12597_p6 = por %p12596_p4, %p12595_p0 }
  0x79   : > { %v1867_v32 = vcombine.high %v1859_v22, %v1859_v22  ;;  %v1868_v33 = vcombine.high %v1866_v23, %v1866_v23  ;;  %v458_v35 = vrot.slane %v444_v15, %v12956_v14  ;;  %v1883_v36 = vrot.slane %v1869_v16, %v12956_v14  ;;  %v242_v16 = vld [vmem:[%s12932_s26 + $0x38] sm:$0xff] }
  0x7a   : > { %3179 = vmatprep.subr.mxu0 %v1850_v27  ;;  %3249 = vmatprep.subr.mxu1 %v1851_v28  ;;  %v459_v38 = vcombine.high %v451_v24, %v451_v24  ;;  %v1884_v41 = vcombine.high %v1876_v25, %v1876_v25  ;;  %v468_v42 = vrot.slane %v237_v21, %v12956_v14  ;;  %v243_v28 = vld [vmem:[%s12932_s26 + $0x40] sm:$0xff]  ;;  %p12598_p12 = pnand %p12597_p6, %p12591_p13 }
  0x7b   : > { %3180 = vmatpush1.xpose.msra.mxu0 %v1842_v17  ;;  %3250 = vmatpush1.xpose.msra.mxu1 %v1849_v18  ;;  %v1893_v43 = vrot.slane %v302_v26, %v12956_v14  ;;  %v460_v45 = vcombine.high %v458_v35, %v458_v35  ;;  %v1885_v46 = vcombine.high %v1883_v36, %v1883_v36 }
  0x7c   : > { %3243 = vmatprep.mubr.f32.mxu0 %v442_v29  ;;  %3313 = vmatprep.mubr.f32.mxu1 %v443_v30  ;;  %v475_v47 = vrot.slane %v461_v34, %v12956_v14  ;;  %v1900_v48 = vrot.slane %v1886_v37, %v12956_v14  ;;  %v476_v52 = vcombine.high %v468_v42, %v468_v42 }
  0x7d   : > { %3319 = vmatprep.subr.mxu0 %v1867_v32  ;;  %3389 = vmatprep.subr.mxu1 %v1868_v33  ;;  %v1901_v53 = vcombine.high %v1893_v43, %v1893_v43  ;;  %v485_v54 = vrot.slane %v238_v31, %v12956_v14  ;;  %v1910_v57 = vrot.slane %v303_v39, %v12956_v14 }
  0x7e   : > { %3244 = vmatmul.mubr.f32.vlgmr.msra.gmra.mrb[0].mxu0 %v434_v19  ;;  %3314 = vmatmul.mubr.f32.vlgmr.msra.gmra.mrb[0].mxu1 %v441_v20  ;;  %v477_v56 = vcombine.high %v475_v47, %v475_v47  ;;  %v492_v58 = vrot.slane %v478_v40, %v12956_v14  ;;  %v1902_v59 = vcombine.high %v1900_v48, %v1900_v48 }
  0x7f   : > { %3320 = vmatpush1.xpose.msra.mxu0 %v1859_v22  ;;  %3383 = vmatprep.mubr.f32.mxu0 %v459_v38  ;;  %v1917_v60 = vrot.slane %v1903_v49, %v12956_v14  ;;  %v493_v0 = vcombine.high %v485_v54, %v485_v54  ;;  %v502_v1 = vrot.slane %v239_v44, %v12956_v14 }
  0x80   : > { %3390 = vmatpush1.xpose.msra.mxu1 %v1866_v23  ;;  %3459 = vmatprep.subr.mxu0 %v1884_v41  ;;  %v1927_v2 = vrot.slane %v304_v50, %v12956_v14  ;;  %v1918_v4 = vcombine.high %v1910_v57, %v1910_v57  ;;  %v494_v5 = vcombine.high %v492_v58, %v492_v58  ;;  %v307_v23 = vld [vmem:[%s12938_s5 + $0x40] sm:$0xff] }
  0x81   : > { %3453 = vmatprep.mubr.f32.mxu1 %v460_v45  ;;  %3529 = vmatprep.subr.mxu1 %v1885_v46  ;;  %v509_v6 = vrot.slane %v495_v51, %v12956_v14  ;;  %v1919_v7 = vcombine.high %v1917_v60, %v1917_v60  ;;  %v1934_v8 = vrot.slane %v1920_v61, %v12956_v14  ;;  %v244_v46 = vld [vmem:[%s12932_s26 + $0x48] sm:$0xff] }
  0x82   : > { %3384 = vmatmul.mubr.f32.vlgmr.msra.gmra.mrb[2].mxu0 %v451_v24  ;;  %v1937_v9 = vcombine.high %v305_v62, %v305_v62  ;;  %v529_v11 = vcombine.high %v241_v3, %v241_v3  ;;  %v510_v12 = vcombine.high %v502_v1, %v502_v1  ;;  %v519_v13 = vrot.slane %v240_v55, %v12956_v14 }
  0x83   : > { %3460 = vmatpush1.xpose.msra.mxu0 %v1876_v25  ;;  %3454 = vmatmul.mubr.f32.vlgmr.msra.gmra.mrb[2].mxu1 %v458_v35  ;;  %v1944_v15 = vrot.slane %v305_v62, %v12956_v14  ;;  %v1935_v17 = vcombine.high %v1927_v2, %v1927_v2  ;;  %v511_v18 = vcombine.high %v509_v6, %v509_v6  ;;  %v308_v35 = vld [vmem:[%s12938_s5 + $0x48] sm:$0xff] }
  0x84   : > { %3523 = vmatprep.mubr.f32.mxu0 %v476_v52  ;;  %3530 = vmatpush1.xpose.msra.mxu1 %v1883_v36  ;;  %v526_v19 = vrot.slane %v512_v63, %v12956_v14  ;;  %v1936_v20 = vcombine.high %v1934_v8, %v1934_v8  ;;  %v1951_v21 = vrot.slane %v1937_v9, %v12956_v14 }
  0x85   : > { %3599 = vmatprep.subr.mxu0 %v1901_v53  ;;  %3593 = vmatprep.mubr.f32.mxu1 %v477_v56  ;;  %v1954_v22 = vcombine.high %v306_v10, %v306_v10  ;;  %v546_v24 = vcombine.high %v242_v16, %v242_v16  ;;  %v527_v25 = vcombine.high %v519_v13, %v519_v13 }
  0x86   : > { %3524 = vmatmul.mubr.f32.vlgmr.msra.gmra.mrb[4].mxu0 %v468_v42  ;;  %3669 = vmatprep.subr.mxu1 %v1902_v59  ;;  %v1952_v26 = vcombine.high %v1944_v15, %v1944_v15  ;;  %v536_v27 = vrot.slane %v241_v3, %v12956_v14  ;;  %v528_v29 = vcombine.high %v526_v19, %v526_v19 }
  0x87   : > { %3600 = vmatpush1.xpose.msra.mxu0 %v1893_v43  ;;  %3594 = vmatmul.mubr.f32.vlgmr.msra.gmra.mrb[4].mxu1 %v475_v47  ;;  %v1961_v30 = vrot.slane %v306_v10, %v12956_v14  ;;  %v543_v31 = vrot.slane %v529_v11, %v12956_v14  ;;  %v1953_v32 = vcombine.high %v1951_v21, %v1951_v21 }
  0x88   : > { %3663 = vmatprep.mubr.f32.mxu0 %v493_v0  ;;  %3670 = vmatpush1.xpose.msra.mxu1 %v1900_v48  ;;  %v1968_v33 = vrot.slane %v1954_v22, %v12956_v14  ;;  %v1971_v34 = vcombine.high %v307_v23, %v307_v23  ;;  %v563_v36 = vcombine.high %v243_v28, %v243_v28  ;;  %v309_v48 = vld [vmem:[%s12938_s5 + $0x50] sm:$0xff] }
  0x89   : > { %3739 = vmatprep.subr.mxu0 %v1918_v4  ;;  %3733 = vmatprep.mubr.f32.mxu1 %v494_v5  ;;  %v544_v37 = vcombine.high %v536_v27, %v536_v27  ;;  %v553_v38 = vrot.slane %v242_v16, %v12956_v14  ;;  %v1978_v39 = vrot.slane %v307_v23, %v12956_v14 }
  0x8a   : > { %3664 = vmatmul.mubr.f32.vlgmr.msra.gmra.mrb[6].mxu0 %v485_v54  ;;  %3809 = vmatprep.subr.mxu1 %v1919_v7  ;;  %v1969_v40 = vcombine.high %v1961_v30, %v1961_v30  ;;  %v545_v41 = vcombine.high %v543_v31, %v543_v31  ;;  %v560_v42 = vrot.slane %v546_v24, %v12956_v14 }
  0x8b   : > { %3740 = vmatpush1.xpose.msra.mxu0 %v1910_v57  ;;  %3734 = vmatmul.mubr.f32.vlgmr.msra.gmra.mrb[6].mxu1 %v492_v58  ;;  %v1970_v43 = vcombine.high %v1968_v33, %v1968_v33  ;;  %v1985_v44 = vrot.slane %v1971_v34, %v12956_v14  ;;  %v1988_v45 = vcombine.high %v308_v35, %v308_v35  ;;  %v245_v58 = vld [vmem:[%s12932_s26 + $0x50] sm:$0xff] }
  0x8c   : > { %3803 = vmatprep.mubr.f32.mxu0 %v510_v12  ;;  %3810 = vmatpush1.xpose.msra.mxu1 %v1917_v60  ;;  %v570_v47 = vrot.slane %v243_v28, %v12956_v14  ;;  %v561_v49 = vcombine.high %v553_v38, %v553_v38  ;;  %v1986_v50 = vcombine.high %v1978_v39, %v1978_v39  ;;  %v310_v60 = vld [vmem:[%s12938_s5 + $0x58] sm:$0xff] }
  0x8d   : > { %3879 = vmatprep.subr.mxu0 %v1935_v17  ;;  %3873 = vmatprep.mubr.f32.mxu1 %v511_v18  ;;  %v1995_v51 = vrot.slane %v308_v35, %v12956_v14  ;;  %v562_v52 = vcombine.high %v560_v42, %v560_v42  ;;  %v577_v53 = vrot.slane %v563_v36, %v12956_v14 }
  0x8e   : > { %3804 = vmatmul.mubr.f32.vlgmr.msra.gmra.mrb[8].mxu0 %v502_v1  ;;  %3949 = vmatprep.subr.mxu1 %v1936_v20  ;;  %v580_v54 = vcombine.high %v244_v46, %v244_v46  ;;  %v1987_v55 = vcombine.high %v1985_v44, %v1985_v44  ;;  %v2002_v56 = vrot.slane %v1988_v45, %v12956_v14  ;;  %v314_v45 = vld [vmem:[%s12938_s5 + $0x78] sm:$0xff] }
  0x8f   : > { %3880 = vmatpush1.xpose.msra.mxu0 %v1927_v2  ;;  %3874 = vmatmul.mubr.f32.vlgmr.msra.gmra.mrb[8].mxu1 %v509_v6  ;;  %v2005_v57 = vcombine.high %v309_v48, %v309_v48  ;;  %v578_v59 = vcombine.high %v570_v47, %v570_v47  ;;  %v2003_v61 = vcombine.high %v1995_v51, %v1995_v51  ;;  %v246_v6 = vld [vmem:[%s12932_s26 + $0x58] sm:$0xff] }
  0x90   : > { %3943 = vmatprep.mubr.f32.mxu0 %v527_v25  ;;  %3950 = vmatpush1.xpose.msra.mxu1 %v1934_v8  ;;  %v587_v62 = vrot.slane %v244_v46, %v12956_v14  ;;  %v2012_v63 = vrot.slane %v309_v48, %v12956_v14  ;;  %v579_v0 = vcombine.high %v577_v53, %v577_v53  ;;  %v311_v8 = vld [vmem:[%s12938_s5 + $0x60] sm:$0xff] }
  0x91   : > { %4019 = vmatprep.subr.mxu0 %v1952_v26  ;;  %4013 = vmatprep.mubr.f32.mxu1 %v528_v29  ;;  %v594_v1 = vrot.slane %v580_v54, %v12956_v14  ;;  %v597_v2 = vcombine.high %v245_v58, %v245_v58  ;;  %v2004_v3 = vcombine.high %v2002_v56, %v2002_v56 }
  0x92   : > { %3944 = vmatmul.mubr.f32.vlgmr.msra.gmra.mrb[10].mxu0 %v519_v13  ;;  %4089 = vmatprep.subr.mxu1 %v1953_v32  ;;  %v2019_v4 = vrot.slane %v2005_v57, %v12956_v14  ;;  %v2022_v5 = vcombine.high %v310_v60, %v310_v60  ;;  %v604_v7 = vrot.slane %v245_v58, %v12956_v14  ;;  %v315_v57 = vld [vmem:[%s12938_s5 + $0x80] sm:$0xff] }
  0x93   : > { %4020 = vmatpush1.xpose.msra.mxu0 %v1944_v15  ;;  %4014 = vmatmul.mubr.f32.vlgmr.msra.gmra.mrb[10].mxu1 %v526_v19  ;;  %v595_v9 = vcombine.high %v587_v62, %v587_v62  ;;  %v2020_v10 = vcombine.high %v2012_v63, %v2012_v63  ;;  %v2029_v11 = vrot.slane %v310_v60, %v12956_v14  ;;  %v247_v19 = vld [vmem:[%s12932_s26 + $0x60] sm:$0xff] }
  0x94   : > { %4083 = vmatprep.mubr.f32.mxu0 %v544_v37  ;;  %4090 = vmatpush1.xpose.msra.mxu1 %v1951_v21  ;;  %v596_v12 = vcombine.high %v594_v1, %v594_v1  ;;  %v611_v13 = vrot.slane %v597_v2, %v12956_v14  ;;  %v614_v15 = vcombine.high %v246_v6, %v246_v6  ;;  %v312_v21 = vld [vmem:[%s12938_s5 + $0x68] sm:$0xff] }
  0x95   : > { %4159 = vmatprep.subr.mxu0 %v1969_v40  ;;  %4153 = vmatprep.mubr.f32.mxu1 %v545_v41  ;;  %v2021_v16 = vcombine.high %v2019_v4, %v2019_v4  ;;  %v2036_v17 = vrot.slane %v2022_v5, %v12956_v14  ;;  %v2039_v18 = vcombine.high %v311_v8, %v311_v8  ;;  %v316_v5 = vld [vmem:[%s12938_s5 + $0x88] sm:$0xff] }
  0x96   : > { %4084 = vmatmul.mubr.f32.vlgmr.msra.gmra.mrb[12].mxu0 %v536_v27  ;;  %4229 = vmatprep.subr.mxu1 %v1970_v43  ;;  %v612_v20 = vcombine.high %v604_v7, %v604_v7  ;;  %v2037_v22 = vcombine.high %v2029_v11, %v2029_v11  ;;  %v621_v23 = vrot.slane %v246_v6, %v12956_v14  ;;  %v249_v43 = vld [vmem:[%s12932_s26 + $0x70] sm:$0xff] }
  0x97   : > { %4160 = vmatpush1.xpose.msra.mxu0 %v1961_v30  ;;  %4154 = vmatmul.mubr.f32.vlgmr.msra.gmra.mrb[12].mxu1 %v543_v31  ;;  %v2046_v24 = vrot.slane %v311_v8, %v12956_v14  ;;  %v613_v25 = vcombine.high %v611_v13, %v611_v13  ;;  %v628_v26 = vrot.slane %v614_v15, %v12956_v14  ;;  %v248_v31 = vld [vmem:[%s12932_s26 + $0x68] sm:$0xff] }
  0x98   : > { %4223 = vmatprep.mubr.f32.mxu0 %v561_v49  ;;  %4230 = vmatpush1.xpose.msra.mxu1 %v1968_v33  ;;  %v631_v27 = vcombine.high %v247_v19, %v247_v19  ;;  %v2038_v28 = vcombine.high %v2036_v17, %v2036_v17  ;;  %v2053_v29 = vrot.slane %v2039_v18, %v12956_v14  ;;  %v313_v33 = vld [vmem:[%s12938_s5 + $0x70] sm:$0xff] }
  0x99   : > { %4299 = vmatprep.subr.mxu0 %v1986_v50  ;;  %4293 = vmatprep.mubr.f32.mxu1 %v562_v52  ;;  %v2056_v30 = vcombine.high %v312_v21, %v312_v21  ;;  %v638_v32 = vrot.slane %v247_v19, %v12956_v14  ;;  %v629_v34 = vcombine.high %v621_v23, %v621_v23  ;;  %v317_v18 = vld [vmem:[%s12938_s5 + $0x90] sm:$0xff] }
  0x9a   : > { %4224 = vmatmul.mubr.f32.vlgmr.msra.gmra.mrb[14].mxu0 %v553_v38  ;;  %4369 = vmatprep.subr.mxu1 %v1987_v55  ;;  %v2054_v35 = vcombine.high %v2046_v24, %v2046_v24  ;;  %v2063_v36 = vrot.slane %v312_v21, %v12956_v14  ;;  %v630_v37 = vcombine.high %v628_v26, %v628_v26  ;;  %v250_v55 = vld [vmem:[%s12932_s26 + $0x78] sm:$0xff] }
  0x9b   : > { %4300 = vmatpush1.xpose.msra.mxu0 %v1978_v39  ;;  %4294 = vmatmul.mubr.f32.vlgmr.msra.gmra.mrb[14].mxu1 %v560_v42  ;;  %v645_v38 = vrot.slane %v631_v27, %v12956_v14  ;;  %v648_v39 = vcombine.high %v248_v31, %v248_v31  ;;  %v2055_v40 = vcombine.high %v2053_v29, %v2053_v29 }
  0x9c   : > { %4363 = vmatprep.mubr.f32.mxu0 %v578_v59  ;;  %4370 = vmatpush1.xpose.msra.mxu1 %v1985_v44  ;;  %v2070_v41 = vrot.slane %v2056_v30, %v12956_v14  ;;  %v2073_v42 = vcombine.high %v313_v33, %v313_v33  ;;  %v646_v44 = vcombine.high %v638_v32, %v638_v32  ;;  %v318_v30 = vld [vmem:[%s12938_s5 + $0x98] sm:$0xff] }
  0x9d   : > { %4439 = vmatprep.subr.mxu0 %v2003_v61  ;;  %4433 = vmatprep.mubr.f32.mxu1 %v579_v0  ;;  %v2071_v46 = vcombine.high %v2063_v36, %v2063_v36  ;;  %v2080_v48 = vrot.slane %v313_v33, %v12956_v14  ;;  %v647_v49 = vcombine.high %v645_v38, %v645_v38 }
  0x9e   : > { %4364 = vmatmul.mubr.f32.vlgmr.msra.gmra.mrb[16].mxu0 %v570_v47  ;;  %4509 = vmatprep.subr.mxu1 %v2004_v3  ;;  %v655_v47 = vrot.slane %v248_v31, %v12956_v14  ;;  %v662_v50 = vrot.slane %v648_v39, %v12956_v14  ;;  %v2072_v52 = vcombine.high %v2070_v41, %v2070_v41  ;;  %v251_v3 = vld [vmem:[%s12932_s26 + $0x80] sm:$0xff] }
  0x9f   : > { %4440 = vmatpush1.xpose.msra.mxu0 %v1995_v51  ;;  %4434 = vmatmul.mubr.f32.vlgmr.msra.gmra.mrb[16].mxu1 %v577_v53  ;;  %v665_v51 = vcombine.high %v249_v43, %v249_v43  ;;  %v2087_v53 = vrot.slane %v2073_v42, %v12956_v14  ;;  %v2090_v54 = vcombine.high %v314_v45, %v314_v45  ;;  %v319_v42 = vld [vmem:[%s12938_s5 + $0xa0] sm:$0xff] }
  0xa0   : > { %4503 = vmatprep.mubr.f32.mxu0 %v595_v9  ;;  %4510 = vmatpush1.xpose.msra.mxu1 %v2002_v56  ;;  %v672_v56 = vrot.slane %v249_v43, %v12956_v14  ;;  %v663_v58 = vcombine.high %v655_v47, %v655_v47  ;;  %v2088_v59 = vcombine.high %v2080_v48, %v2080_v48 }
  0xa1   : > { %4579 = vmatprep.subr.mxu0 %v2020_v10  ;;  %4573 = vmatprep.mubr.f32.mxu1 %v596_v12  ;;  %v2097_v60 = vrot.slane %v314_v45, %v12956_v14  ;;  %v664_v61 = vcombine.high %v662_v50, %v662_v50  ;;  %v2089_v0 = vcombine.high %v2087_v53, %v2087_v53 }
  0xa2   : > { %4504 = vmatmul.mubr.f32.vlgmr.msra.gmra.mrb[18].mxu0 %v587_v62  ;;  %4649 = vmatprep.subr.mxu1 %v2021_v16  ;;  %v679_v62 = vrot.slane %v665_v51, %v12956_v14  ;;  %v2107_v2 = vcombine.high %v315_v57, %v315_v57  ;;  %v2114_v8 = vrot.slane %v315_v57, %v12956_v14  ;;  %v252_v16 = vld [vmem:[%s12932_s26 + $0x88] sm:$0xff] }
  0xa3   : > { %4580 = vmatpush1.xpose.msra.mxu0 %v2012_v63  ;;  %4574 = vmatmul.mubr.f32.vlgmr.msra.gmra.mrb[18].mxu1 %v594_v1  ;;  %v682_v63 = vcombine.high %v250_v55, %v250_v55  ;;  %v2104_v1 = vrot.slane %v2090_v54, %v12956_v14  ;;  %v2105_v6 = vcombine.high %v2097_v60, %v2097_v60  ;;  %v320_v54 = vld [vmem:[%s12938_s5 + $0xa8] sm:$0xff] }
  0xa4   : > { %4643 = vmatprep.mubr.f32.mxu0 %v612_v20  ;;  %4650 = vmatpush1.xpose.msra.mxu1 %v2019_v4  ;;  %v680_v4 = vcombine.high %v672_v56, %v672_v56  ;;  %v681_v9 = vcombine.high %v679_v62, %v679_v62  ;;  %v2124_v15 = vcombine.high %v316_v5, %v316_v5 }
  0xa5   : > { %4719 = vmatprep.subr.mxu0 %v2037_v22  ;;  %4713 = vmatprep.mubr.f32.mxu1 %v613_v25  ;;  %v696_v10 = vrot.slane %v682_v63, %v12956_v14  ;;  %v2106_v12 = vcombine.high %v2104_v1, %v2104_v1  ;;  %v2122_v20 = vcombine.high %v2114_v8, %v2114_v8 }
  0xa6   : > { %4644 = vmatmul.mubr.f32.vlgmr.msra.gmra.mrb[20].mxu0 %v604_v7  ;;  %4789 = vmatprep.subr.mxu1 %v2038_v28  ;;  %v689_v7 = vrot.slane %v250_v55, %v12956_v14  ;;  %v2131_v21 = vrot.slane %v316_v5, %v12956_v14  ;;  %v2141_v27 = vcombine.high %v317_v18, %v317_v18  ;;  %v253_v28 = vld [vmem:[%s12932_s26 + $0x90] sm:$0xff] }
  0xa7   : > { %4720 = vmatpush1.xpose.msra.mxu0 %v2029_v11  ;;  %4714 = vmatmul.mubr.f32.vlgmr.msra.gmra.mrb[20].mxu1 %v611_v13  ;;  %v699_v11 = vcombine.high %v251_v3, %v251_v3  ;;  %v2121_v13 = vrot.slane %v2107_v2, %v12956_v14  ;;  %v698_v22 = vcombine.high %v696_v10, %v696_v10  ;;  %v321_v2 = vld [vmem:[%s12938_s5 + $0xb0] sm:$0xff] }
  0xa8   : > { %4783 = vmatprep.mubr.f32.mxu0 %v629_v34  ;;  %4790 = vmatpush1.xpose.msra.mxu1 %v2036_v17  ;;  %v706_v17 = vrot.slane %v251_v3, %v12956_v14  ;;  %v697_v19 = vcombine.high %v689_v7, %v689_v7  ;;  %v2139_v31 = vcombine.high %v2131_v21, %v2131_v21 }
  0xa9   : > { %4859 = vmatprep.subr.mxu0 %v2054_v35  ;;  %4853 = vmatprep.mubr.f32.mxu1 %v630_v37  ;;  %v2123_v25 = vcombine.high %v2121_v13, %v2121_v13  ;;  %v2148_v33 = vrot.slane %v317_v18, %v12956_v14  ;;  %v2158_v39 = vcombine.high %v318_v30, %v318_v30 }
  0xaa   : > { %4784 = vmatmul.mubr.f32.vlgmr.msra.gmra.mrb[22].mxu0 %v621_v23  ;;  %4929 = vmatprep.subr.mxu1 %v2055_v40  ;;  %v713_v23 = vrot.slane %v699_v11, %v12956_v14  ;;  %v254_v40 = vld [vmem:[%s12932_s26 + $0x98] sm:$0xff]  ;;  %v2165_v45 = vrot.slane %v318_v30, %v12956_v14  ;;  %v2175_v51 = vcombine.high %v319_v42, %v319_v42 }
  0xab   : > { %4860 = vmatpush1.xpose.msra.mxu0 %v2046_v24  ;;  %4854 = vmatmul.mubr.f32.vlgmr.msra.gmra.mrb[22].mxu1 %v628_v26  ;;  %v716_v24 = vcombine.high %v252_v16, %v252_v16  ;;  %v2138_v26 = vrot.slane %v2124_v15, %v12956_v14  ;;  %v2182_v57 = vrot.slane %v319_v42, %v12956_v14  ;;  %v322_v15 = vld [vmem:[%s12938_s5 + $0xb8] sm:$0xff] }
  0xac   : > { %4923 = vmatprep.mubr.f32.mxu0 %v646_v44  ;;  %4930 = vmatpush1.xpose.msra.mxu1 %v2053_v29  ;;  %v714_v29 = vcombine.high %v706_v17, %v706_v17  ;;  %v715_v34 = vcombine.high %v713_v23, %v713_v23  ;;  %v2156_v44 = vcombine.high %v2148_v33, %v2148_v33 }
  0xad   : > { %4999 = vmatprep.subr.mxu0 %v2071_v46  ;;  %4993 = vmatprep.mubr.f32.mxu1 %v647_v49  ;;  %v730_v35 = vrot.slane %v716_v24, %v12956_v14  ;;  %v2140_v37 = vcombine.high %v2138_v26, %v2138_v26  ;;  %v2173_v55 = vcombine.high %v2165_v45, %v2165_v45 }
  0xae   : > { %4924 = vmatmul.mubr.f32.vlgmr.msra.gmra.mrb[24].mxu0 %v638_v32  ;;  %5069 = vmatprep.subr.mxu1 %v2072_v52  ;;  %v723_v32 = vrot.slane %v252_v16, %v12956_v14  ;;  %v255_v52 = vld [vmem:[%s12932_s26 + $0xa0] sm:$0xff]  ;;  %v2192_v63 = vcombine.high %v320_v54, %v320_v54  ;;  %v2199_v5 = vrot.slane %v320_v54, %v12956_v14 }
  0xaf   : > { %5000 = vmatpush1.xpose.msra.mxu0 %v2063_v36  ;;  %4994 = vmatmul.mubr.f32.vlgmr.msra.gmra.mrb[24].mxu1 %v645_v38  ;;  %v733_v36 = vcombine.high %v253_v28, %v253_v28  ;;  %v2155_v38 = vrot.slane %v2141_v27, %v12956_v14  ;;  %v732_v46 = vcombine.high %v730_v35, %v730_v35  ;;  %v323_v27 = vld [vmem:[%s12938_s5 + $0xc0] sm:$0xff] }
  0xb0   : > { %5063 = vmatprep.mubr.f32.mxu0 %v663_v58  ;;  %5070 = vmatpush1.xpose.msra.mxu1 %v2070_v41  ;;  %v740_v41 = vrot.slane %v253_v28, %v12956_v14  ;;  %v731_v43 = vcombine.high %v723_v32, %v723_v32  ;;  %v2209_v11 = vcombine.high %v321_v2, %v321_v2 }
  0xb1   : > { %5139 = vmatprep.subr.mxu0 %v2088_v59  ;;  %5133 = vmatprep.mubr.f32.mxu1 %v664_v61  ;;  %v2157_v49 = vcombine.high %v2155_v38, %v2155_v38  ;;  %v2207_v16 = vcombine.high %v2199_v5, %v2199_v5  ;;  %v2216_v18 = vrot.slane %v321_v2, %v12956_v14 }
  0xb2   : > { %5064 = vmatmul.mubr.f32.vlgmr.msra.gmra.mrb[26].mxu0 %v655_v47  ;;  %5209 = vmatprep.subr.mxu1 %v2089_v0  ;;  %v747_v47 = vrot.slane %v733_v36, %v12956_v14  ;;  %v256_v0 = vld [vmem:[%s12932_s26 + $0xa8] sm:$0xff]  ;;  %v2226_v24 = vcombine.high %v322_v15, %v322_v15  ;;  %v2233_v30 = vrot.slane %v322_v15, %v12956_v14 }
  0xb3   : > { %5140 = vmatpush1.xpose.msra.mxu0 %v2080_v48  ;;  %5134 = vmatmul.mubr.f32.vlgmr.msra.gmra.mrb[26].mxu1 %v662_v50  ;;  %v750_v48 = vcombine.high %v254_v40, %v254_v40  ;;  %v2172_v50 = vrot.slane %v2158_v39, %v12956_v14  ;;  %v2243_v36 = vcombine.high %v323_v27, %v323_v27  ;;  %v324_v39 = vld [vmem:[%s12938_s5 + $0xc8] sm:$0xff] }
  0xb4   : > { %5203 = vmatprep.mubr.f32.mxu0 %v680_v4  ;;  %5210 = vmatpush1.xpose.msra.mxu1 %v2087_v53  ;;  %v748_v53 = vcombine.high %v740_v41, %v740_v41  ;;  %v749_v58 = vcombine.high %v747_v47, %v747_v47  ;;  %v2190_v4 = vcombine.high %v2182_v57, %v2182_v57 }
  0xb5   : > { %5279 = vmatprep.subr.mxu0 %v2105_v6  ;;  %5273 = vmatprep.mubr.f32.mxu1 %v681_v9  ;;  %v764_v59 = vrot.slane %v750_v48, %v12956_v14  ;;  %v2174_v61 = vcombine.high %v2172_v50, %v2172_v50  ;;  %v2250_v42 = vrot.slane %v323_v27, %v12956_v14 }
  0xb6   : > { %5204 = vmatmul.mubr.f32.vlgmr.msra.gmra.mrb[28].mxu0 %v672_v56  ;;  %5349 = vmatprep.subr.mxu1 %v2106_v12  ;;  %v757_v56 = vrot.slane %v254_v40, %v12956_v14  ;;  %v257_v12 = vld [vmem:[%s12932_s26 + $0xb0] sm:$0xff]  ;;  %v2241_v40 = vcombine.high %v2233_v30, %v2233_v30  ;;  %v2260_v48 = vcombine.high %v324_v39, %v324_v39 }
  0xb7   : > { %5280 = vmatpush1.xpose.msra.mxu0 %v2097_v60  ;;  %5274 = vmatmul.mubr.f32.vlgmr.msra.gmra.mrb[28].mxu1 %v679_v62  ;;  %v767_v60 = vcombine.high %v255_v52, %v255_v52  ;;  %v2189_v62 = vrot.slane %v2175_v51, %v12956_v14  ;;  %v766_v6 = vcombine.high %v764_v59, %v764_v59  ;;  %v325_v51 = vld [vmem:[%s12938_s5 + $0xd0] sm:$0xff] }
  0xb8   : > { %5343 = vmatprep.mubr.f32.mxu0 %v697_v19  ;;  %5350 = vmatpush1.xpose.msra.mxu1 %v2104_v1  ;;  %v774_v1 = vrot.slane %v255_v52, %v12956_v14  ;;  %v765_v3 = vcombine.high %v757_v56, %v757_v56  ;;  %v2267_v54 = vrot.slane %v324_v39, %v12956_v14 }
  0xb9   : > { %5419 = vmatprep.subr.mxu0 %v2122_v20  ;;  %5413 = vmatprep.mubr.f32.mxu1 %v698_v22  ;;  %v2191_v9 = vcombine.high %v2189_v62, %v2189_v62  ;;  %v2284_v2 = vrot.slane %v325_v51, %v12956_v14 }
  0xba   : > { %5344 = vmatmul.mubr.f32.vlgmr.msra.gmra.mrb[30].mxu0 %v689_v7  ;;  %5489 = vmatprep.subr.mxu1 %v2123_v25  ;;  %v781_v7 = vrot.slane %v767_v60, %v12956_v14  ;;  %v258_v25 = vld [vmem:[%s12932_s26 + $0xb8] sm:$0xff]  ;;  %v2277_v60 = vcombine.high %v325_v51, %v325_v51 }
  0xbb   : > { %5420 = vmatpush1.xpose.msra.mxu0 %v2114_v8  ;;  %5414 = vmatmul.mubr.f32.vlgmr.msra.gmra.mrb[30].mxu1 %v696_v10  ;;  %v784_v8 = vcombine.high %v256_v0, %v256_v0  ;;  %v2206_v10 = vrot.slane %v2192_v63, %v12956_v14  ;;  %v326_v63 = vld [vmem:[%s12938_s5 + $0xd8] sm:$0xff] }
  0xbc   : > { %5483 = vmatprep.mubr.f32.mxu0 %v714_v29  ;;  %5490 = vmatpush1.xpose.msra.mxu1 %v2121_v13  ;;  %v782_v13 = vcombine.high %v774_v1, %v774_v1  ;;  %v783_v19 = vcombine.high %v781_v7, %v781_v7  ;;  %v2224_v29 = vcombine.high %v2216_v18, %v2216_v18 }
  0xbd   : > { %5559 = vmatprep.subr.mxu0 %v2139_v31  ;;  %5553 = vmatprep.mubr.f32.mxu1 %v715_v34  ;;  %v798_v20 = vrot.slane %v784_v8, %v12956_v14  ;;  %v2208_v22 = vcombine.high %v2206_v10, %v2206_v10  ;;  %v2294_v8 = vcombine.high %v326_v63, %v326_v63 }
  0xbe   : > { %5484 = vmatmul.mubr.f32.vlgmr.msra.gmra.mrb[32].mxu0 %v706_v17  ;;  %5629 = vmatprep.subr.mxu1 %v2140_v37  ;;  %v791_v17 = vrot.slane %v256_v0, %v12956_v14  ;;  %v259_v37 = vld [vmem:[%s12932_s26 + $0xc0] sm:$0xff]  ;;  %v2275_v0 = vcombine.high %v2267_v54, %v2267_v54  ;;  %v2301_v15 = vrot.slane %v326_v63, %v12956_v14 }
  0xbf   : > { %5560 = vmatpush1.xpose.msra.mxu0 %v2131_v21  ;;  %5554 = vmatmul.mubr.f32.vlgmr.msra.gmra.mrb[32].mxu1 %v713_v23  ;;  %v801_v21 = vcombine.high %v257_v12, %v257_v12  ;;  %v2223_v23 = vrot.slane %v2209_v11, %v12956_v14  ;;  %v800_v31 = vcombine.high %v798_v20, %v798_v20  ;;  %v327_v11 = vld [vmem:[%s12938_s5 + $0xe0] sm:$0xff] }
  0xc0   : > { %5623 = vmatprep.mubr.f32.mxu0 %v731_v43  ;;  %5630 = vmatpush1.xpose.msra.mxu1 %v2138_v26  ;;  %v808_v26 = vrot.slane %v257_v12, %v12956_v14  ;;  %v799_v28 = vcombine.high %v791_v17, %v791_v17  ;;  %v2318_v27 = vrot.slane %v327_v11, %v12956_v14 }
  0xc1   : > { %5699 = vmatprep.subr.mxu0 %v2156_v44  ;;  %5693 = vmatprep.mubr.f32.mxu1 %v732_v46  ;;  %v2225_v34 = vcombine.high %v2223_v23, %v2223_v23 }
  0xc2   : > { %5624 = vmatmul.mubr.f32.vlgmr.msra.gmra.mrb[34].mxu0 %v723_v32  ;;  %5769 = vmatprep.subr.mxu1 %v2157_v49  ;;  %v815_v32 = vrot.slane %v801_v21, %v12956_v14  ;;  %v260_v49 = vld [vmem:[%s12932_s26 + $0xc8] sm:$0xff]  ;;  %v2311_v21 = vcombine.high %v327_v11, %v327_v11 }
  0xc3   : > { %5700 = vmatpush1.xpose.msra.mxu0 %v2148_v33  ;;  %5694 = vmatmul.mubr.f32.vlgmr.msra.gmra.mrb[34].mxu1 %v730_v35  ;;  %v818_v33 = vcombine.high %v258_v25, %v258_v25  ;;  %v2240_v35 = vrot.slane %v2226_v24, %v12956_v14  ;;  %v328_v24 = vld [vmem:[%s12938_s5 + $0xe8] sm:$0xff] }
  0xc4   : > { %5763 = vmatprep.mubr.f32.mxu0 %v748_v53  ;;  %5770 = vmatpush1.xpose.msra.mxu1 %v2155_v38  ;;  %v816_v38 = vcombine.high %v808_v26, %v808_v26  ;;  %v817_v43 = vcombine.high %v815_v32, %v815_v32  ;;  %v2258_v53 = vcombine.high %v2250_v42, %v2250_v42 }
  0xc5   : > { %5839 = vmatprep.subr.mxu0 %v2173_v55  ;;  %5833 = vmatprep.mubr.f32.mxu1 %v749_v58  ;;  %v832_v44 = vrot.slane %v818_v33, %v12956_v14  ;;  %v2242_v46 = vcombine.high %v2240_v35, %v2240_v35  ;;  %v2328_v33 = vcombine.high %v328_v24, %v328_v24 }
  0xc6   : > { %5764 = vmatmul.mubr.f32.vlgmr.msra.gmra.mrb[36].mxu0 %v740_v41  ;;  %5909 = vmatprep.subr.mxu1 %v2174_v61  ;;  %v825_v41 = vrot.slane %v258_v25, %v12956_v14  ;;  %v261_v61 = vld [vmem:[%s12932_s26 + $0xd0] sm:$0xff]  ;;  %v2309_v25 = vcombine.high %v2301_v15, %v2301_v15  ;;  %v2335_v39 = vrot.slane %v328_v24, %v12956_v14 }
  0xc7   : > { %5840 = vmatpush1.xpose.msra.mxu0 %v2165_v45  ;;  %5834 = vmatmul.mubr.f32.vlgmr.msra.gmra.mrb[36].mxu1 %v747_v47  ;;  %v835_v45 = vcombine.high %v259_v37, %v259_v37  ;;  %v2257_v47 = vrot.slane %v2243_v36, %v12956_v14  ;;  %v834_v55 = vcombine.high %v832_v44, %v832_v44  ;;  %v329_v36 = vld [vmem:[%s12938_s5 + $0xf0] sm:$0xff] }
  0xc8   : > { %5903 = vmatprep.mubr.f32.mxu0 %v765_v3  ;;  %5910 = vmatpush1.xpose.msra.mxu1 %v2172_v50  ;;  %v842_v50 = vrot.slane %v259_v37, %v12956_v14  ;;  %v833_v52 = vcombine.high %v825_v41, %v825_v41  ;;  %v2352_v51 = vrot.slane %v329_v36, %v12956_v14 }
  0xc9   : > { %5979 = vmatprep.subr.mxu0 %v2190_v4  ;;  %5973 = vmatprep.mubr.f32.mxu1 %v766_v6  ;;  %v2259_v58 = vcombine.high %v2257_v47, %v2257_v47 }
  0xca   : > { %5904 = vmatmul.mubr.f32.vlgmr.msra.gmra.mrb[38].mxu0 %v757_v56  ;;  %6049 = vmatprep.subr.mxu1 %v2191_v9  ;;  %v849_v56 = vrot.slane %v835_v45, %v12956_v14  ;;  %v262_v9 = vld [vmem:[%s12932_s26 + $0xd8] sm:$0xff]  ;;  %v2345_v45 = vcombine.high %v329_v36, %v329_v36 }
  0xcb   : > { %5980 = vmatpush1.xpose.msra.mxu0 %v2182_v57  ;;  %5974 = vmatmul.mubr.f32.vlgmr.msra.gmra.mrb[38].mxu1 %v764_v59  ;;  %v852_v57 = vcombine.high %v260_v49, %v260_v49  ;;  %v2274_v59 = vrot.slane %v2260_v48, %v12956_v14  ;;  %v330_v48 = vld [vmem:[%s12938_s5 + $0xf8] sm:$0xff] }
  0xcc   : > { %6043 = vmatprep.mubr.f32.mxu0 %v782_v13  ;;  %6050 = vmatpush1.xpose.msra.mxu1 %v2189_v62  ;;  %v850_v62 = vcombine.high %v842_v50, %v842_v50  ;;  %v851_v3 = vcombine.high %v849_v56, %v849_v56  ;;  %v2292_v13 = vcombine.high %v2284_v2, %v2284_v2 }
  0xcd   : > { %6119 = vmatprep.subr.mxu0 %v2207_v16  ;;  %6113 = vmatprep.mubr.f32.mxu1 %v783_v19  ;;  %v866_v4 = vrot.slane %v852_v57, %v12956_v14  ;;  %v2276_v6 = vcombine.high %v2274_v59, %v2274_v59  ;;  %v2362_v57 = vcombine.high %v330_v48, %v330_v48 }
  0xce   : > { %6044 = vmatmul.mubr.f32.vlgmr.msra.gmra.mrb[40].mxu0 %v774_v1  ;;  %6189 = vmatprep.subr.mxu1 %v2208_v22  ;;  %v859_v1 = vrot.slane %v260_v49, %v12956_v14  ;;  %v263_v22 = vld [vmem:[%s12932_s26 + $0xe0] sm:$0xff]  ;;  %v2343_v49 = vcombine.high %v2335_v39, %v2335_v39  ;;  %v2369_v63 = vrot.slane %v330_v48, %v12956_v14 }
  0xcf   : > { %6120 = vmatpush1.xpose.msra.mxu0 %v2199_v5  ;;  %6114 = vmatmul.mubr.f32.vlgmr.msra.gmra.mrb[40].mxu1 %v781_v7  ;;  %v869_v5 = vcombine.high %v261_v61, %v261_v61  ;;  %v2291_v7 = vrot.slane %v2277_v60, %v12956_v14  ;;  %v868_v16 = vcombine.high %v866_v4, %v866_v4  ;;  %v331_v60 = vld [vmem:[%s12938_s5 + $0x100] sm:$0xff] }
  0xd0   : > { %6183 = vmatprep.mubr.f32.mxu0 %v799_v28  ;;  %6190 = vmatpush1.xpose.msra.mxu1 %v2206_v10  ;;  %v876_v10 = vrot.slane %v261_v61, %v12956_v14  ;;  %v867_v12 = vcombine.high %v859_v1, %v859_v1  ;;  %v2386_v11 = vrot.slane %v331_v60, %v12956_v14 }
  0xd1   : > { %6259 = vmatprep.subr.mxu0 %v2224_v29  ;;  %6253 = vmatprep.mubr.f32.mxu1 %v800_v31  ;;  %v2293_v19 = vcombine.high %v2291_v7, %v2291_v7 }
  0xd2   : > { %6184 = vmatmul.mubr.f32.vlgmr.msra.gmra.mrb[42].mxu0 %v791_v17  ;;  %6329 = vmatprep.subr.mxu1 %v2225_v34  ;;  %v883_v17 = vrot.slane %v869_v5, %v12956_v14  ;;  %v264_v34 = vld [vmem:[%s12932_s26 + $0xe8] sm:$0xff]  ;;  %v2379_v5 = vcombine.high %v331_v60, %v331_v60 }
  0xd3   : > { %6260 = vmatpush1.xpose.msra.mxu0 %v2216_v18  ;;  %6254 = vmatmul.mubr.f32.vlgmr.msra.gmra.mrb[42].mxu1 %v798_v20  ;;  %v886_v18 = vcombine.high %v262_v9, %v262_v9  ;;  %v2308_v20 = vrot.slane %v2294_v8, %v12956_v14  ;;  %v332_v8 = vld [vmem:[%s12938_s5 + $0x108] sm:$0xff] }
  0xd4   : > { %6323 = vmatprep.mubr.f32.mxu0 %v816_v38  ;;  %6330 = vmatpush1.xpose.msra.mxu1 %v2223_v23  ;;  %v884_v23 = vcombine.high %v876_v10, %v876_v10  ;;  %v885_v28 = vcombine.high %v883_v17, %v883_v17  ;;  %v2326_v38 = vcombine.high %v2318_v27, %v2318_v27 }
  0xd5   : > { %6399 = vmatprep.subr.mxu0 %v2241_v40  ;;  %6393 = vmatprep.mubr.f32.mxu1 %v817_v43  ;;  %v900_v29 = vrot.slane %v886_v18, %v12956_v14  ;;  %v2310_v31 = vcombine.high %v2308_v20, %v2308_v20  ;;  %v2396_v18 = vcombine.high %v332_v8, %v332_v8 }
  0xd6   : > { %6324 = vmatmul.mubr.f32.vlgmr.msra.gmra.mrb[44].mxu0 %v808_v26  ;;  %6469 = vmatprep.subr.mxu1 %v2242_v46  ;;  %v893_v26 = vrot.slane %v262_v9, %v12956_v14  ;;  %v265_v46 = vld [vmem:[%s12932_s26 + $0xf0] sm:$0xff]  ;;  %v2377_v9 = vcombine.high %v2369_v63, %v2369_v63  ;;  %v2403_v24 = vrot.slane %v332_v8, %v12956_v14 }
  0xd7   : > { %6400 = vmatpush1.xpose.msra.mxu0 %v2233_v30  ;;  %6394 = vmatmul.mubr.f32.vlgmr.msra.gmra.mrb[44].mxu1 %v815_v32  ;;  %v903_v30 = vcombine.high %v263_v22, %v263_v22  ;;  %v2325_v32 = vrot.slane %v2311_v21, %v12956_v14  ;;  %v902_v40 = vcombine.high %v900_v29, %v900_v29  ;;  %v333_v21 = vld [vmem:[%s12938_s5 + $0x110] sm:$0xff] }
  0xd8   : > { %6463 = vmatprep.mubr.f32.mxu0 %v833_v52  ;;  %6470 = vmatpush1.xpose.msra.mxu1 %v2240_v35  ;;  %v910_v35 = vrot.slane %v263_v22, %v12956_v14  ;;  %v901_v37 = vcombine.high %v893_v26, %v893_v26  ;;  %v2420_v36 = vrot.slane %v333_v21, %v12956_v14 }
  0xd9   : > { %6539 = vmatprep.subr.mxu0 %v2258_v53  ;;  %6533 = vmatprep.mubr.f32.mxu1 %v834_v55  ;;  %v2327_v43 = vcombine.high %v2325_v32, %v2325_v32 }
  0xda   : > { %6464 = vmatmul.mubr.f32.vlgmr.msra.gmra.mrb[46].mxu0 %v825_v41  ;;  %6609 = vmatprep.subr.mxu1 %v2259_v58  ;;  %v917_v41 = vrot.slane %v903_v30, %v12956_v14  ;;  %v266_v58 = vld [vmem:[%s12932_s26 + $0xf8] sm:$0xff]  ;;  %v2413_v30 = vcombine.high %v333_v21, %v333_v21 }
  0xdb   : > { %6540 = vmatpush1.xpose.msra.mxu0 %v2250_v42  ;;  %6534 = vmatmul.mubr.f32.vlgmr.msra.gmra.mrb[46].mxu1 %v832_v44  ;;  %v920_v42 = vcombine.high %v264_v34, %v264_v34  ;;  %v2342_v44 = vrot.slane %v2328_v33, %v12956_v14  ;;  %v334_v33 = vld [vmem:[%s12938_s5 + $0x118] sm:$0xff] }
  0xdc   : > { %6603 = vmatprep.mubr.f32.mxu0 %v850_v62  ;;  %6610 = vmatpush1.xpose.msra.mxu1 %v2257_v47  ;;  %v918_v47 = vcombine.high %v910_v35, %v910_v35  ;;  %v919_v52 = vcombine.high %v917_v41, %v917_v41  ;;  %v2360_v62 = vcombine.high %v2352_v51, %v2352_v51 }
  0xdd   : > { %6679 = vmatprep.subr.mxu0 %v2275_v0  ;;  %6673 = vmatprep.mubr.f32.mxu1 %v851_v3  ;;  %v934_v53 = vrot.slane %v920_v42, %v12956_v14  ;;  %v2344_v55 = vcombine.high %v2342_v44, %v2342_v44  ;;  %v2430_v42 = vcombine.high %v334_v33, %v334_v33 }
  0xde   : > { %6604 = vmatmul.mubr.f32.vlgmr.msra.gmra.mrb[48].mxu0 %v842_v50  ;;  %6749 = vmatprep.subr.mxu1 %v2276_v6  ;;  %v927_v50 = vrot.slane %v264_v34, %v12956_v14  ;;  %v267_v6 = vld [vmem:[%s12932_s26 + $0x100] sm:$0xff]  ;;  %v2411_v34 = vcombine.high %v2403_v24, %v2403_v24  ;;  %v2437_v48 = vrot.slane %v334_v33, %v12956_v14 }
  0xdf   : > { %6680 = vmatpush1.xpose.msra.mxu0 %v2267_v54  ;;  %6674 = vmatmul.mubr.f32.vlgmr.msra.gmra.mrb[48].mxu1 %v849_v56  ;;  %v937_v54 = vcombine.high %v265_v46, %v265_v46  ;;  %v2359_v56 = vrot.slane %v2345_v45, %v12956_v14  ;;  %v936_v0 = vcombine.high %v934_v53, %v934_v53  ;;  %v335_v45 = vld [vmem:[%s12938_s5 + $0x120] sm:$0xff] }
  0xe0   : > { %6743 = vmatprep.mubr.f32.mxu0 %v867_v12  ;;  %6750 = vmatpush1.xpose.msra.mxu1 %v2274_v59  ;;  %v944_v59 = vrot.slane %v265_v46, %v12956_v14  ;;  %v935_v61 = vcombine.high %v927_v50, %v927_v50  ;;  %v2454_v60 = vrot.slane %v335_v45, %v12956_v14 }
  0xe1   : > { %6819 = vmatprep.subr.mxu0 %v2292_v13  ;;  %6813 = vmatprep.mubr.f32.mxu1 %v868_v16  ;;  %v2361_v3 = vcombine.high %v2359_v56, %v2359_v56 }
  0xe2   : > { %6744 = vmatmul.mubr.f32.vlgmr.msra.gmra.mrb[50].mxu0 %v859_v1  ;;  %6889 = vmatprep.subr.mxu1 %v2293_v19  ;;  %v951_v1 = vrot.slane %v937_v54, %v12956_v14  ;;  %v268_v19 = vld [vmem:[%s12932_s26 + $0x108] sm:$0xff]  ;;  %v2447_v54 = vcombine.high %v335_v45, %v335_v45 }
  0xe3   : > { %6820 = vmatpush1.xpose.msra.mxu0 %v2284_v2  ;;  %6814 = vmatmul.mubr.f32.vlgmr.msra.gmra.mrb[50].mxu1 %v866_v4  ;;  %v954_v2 = vcombine.high %v266_v58, %v266_v58  ;;  %v2376_v4 = vrot.slane %v2362_v57, %v12956_v14  ;;  %v336_v57 = vld [vmem:[%s12938_s5 + $0x128] sm:$0xff] }
  0xe4   : > { %6883 = vmatprep.mubr.f32.mxu0 %v884_v23  ;;  %6890 = vmatpush1.xpose.msra.mxu1 %v2291_v7  ;;  %v952_v7 = vcombine.high %v944_v59, %v944_v59  ;;  %v953_v12 = vcombine.high %v951_v1, %v951_v1  ;;  %v2394_v23 = vcombine.high %v2386_v11, %v2386_v11 }
  0xe5   : > { %6959 = vmatprep.subr.mxu0 %v2309_v25  ;;  %6953 = vmatprep.mubr.f32.mxu1 %v885_v28  ;;  %v968_v13 = vrot.slane %v954_v2, %v12956_v14  ;;  %v2378_v16 = vcombine.high %v2376_v4, %v2376_v4  ;;  %v2464_v2 = vcombine.high %v336_v57, %v336_v57 }
  0xe6   : > { %6884 = vmatmul.mubr.f32.vlgmr.msra.gmra.mrb[52].mxu0 %v876_v10  ;;  %7029 = vmatprep.subr.mxu1 %v2310_v31  ;;  %v961_v10 = vrot.slane %v266_v58, %v12956_v14  ;;  %v269_v31 = vld [vmem:[%s12932_s26 + $0x110] sm:$0xff]  ;;  %v2445_v58 = vcombine.high %v2437_v48, %v2437_v48  ;;  %v2471_v8 = vrot.slane %v336_v57, %v12956_v14 }
  0xe7   : > { %6960 = vmatpush1.xpose.msra.mxu0 %v2301_v15  ;;  %6954 = vmatmul.mubr.f32.vlgmr.msra.gmra.mrb[52].mxu1 %v883_v17  ;;  %v971_v15 = vcombine.high %v267_v6, %v267_v6  ;;  %v2393_v17 = vrot.slane %v2379_v5, %v12956_v14  ;;  %v970_v25 = vcombine.high %v968_v13, %v968_v13  ;;  %v337_v5 = vld [vmem:[%s12938_s5 + $0x130] sm:$0xff] }
  0xe8   : > { %7023 = vmatprep.mubr.f32.mxu0 %v901_v37  ;;  %7030 = vmatpush1.xpose.msra.mxu1 %v2308_v20  ;;  %v978_v20 = vrot.slane %v267_v6, %v12956_v14  ;;  %v969_v22 = vcombine.high %v961_v10, %v961_v10  ;;  %v2488_v21 = vrot.slane %v337_v5, %v12956_v14 }
  0xe9   : > { %7099 = vmatprep.subr.mxu0 %v2326_v38  ;;  %7093 = vmatprep.mubr.f32.mxu1 %v902_v40  ;;  %v2395_v28 = vcombine.high %v2393_v17, %v2393_v17 }
  0xea   : > { %7024 = vmatmul.mubr.f32.vlgmr.msra.gmra.mrb[54].mxu0 %v893_v26  ;;  %7169 = vmatprep.subr.mxu1 %v2327_v43  ;;  %v985_v26 = vrot.slane %v971_v15, %v12956_v14  ;;  %v270_v43 = vld [vmem:[%s12932_s26 + $0x118] sm:$0xff]  ;;  %v2481_v15 = vcombine.high %v337_v5, %v337_v5 }
  0xeb   : > { %7100 = vmatpush1.xpose.msra.mxu0 %v2318_v27  ;;  %7094 = vmatmul.mubr.f32.vlgmr.msra.gmra.mrb[54].mxu1 %v900_v29  ;;  %v988_v27 = vcombine.high %v268_v19, %v268_v19  ;;  %v2410_v29 = vrot.slane %v2396_v18, %v12956_v14  ;;  %v338_v18 = vld [vmem:[%s12938_s5 + $0x138] sm:$0xff] }
  0xec   : > { %7163 = vmatprep.mubr.f32.mxu0 %v918_v47  ;;  %7170 = vmatpush1.xpose.msra.mxu1 %v2325_v32  ;;  %v986_v32 = vcombine.high %v978_v20, %v978_v20  ;;  %v987_v37 = vcombine.high %v985_v26, %v985_v26  ;;  %v2428_v47 = vcombine.high %v2420_v36, %v2420_v36 }
  0xed   : > { %7239 = vmatprep.subr.mxu0 %v2343_v49  ;;  %7233 = vmatprep.mubr.f32.mxu1 %v919_v52  ;;  %v1002_v38 = vrot.slane %v988_v27, %v12956_v14  ;;  %v2412_v40 = vcombine.high %v2410_v29, %v2410_v29  ;;  %v2498_v27 = vcombine.high %v338_v18, %v338_v18 }
  0xee   : > { %7164 = vmatmul.mubr.f32.vlgmr.msra.gmra.mrb[56].mxu0 %v910_v35  ;;  %7309 = vmatprep.subr.mxu1 %v2344_v55  ;;  %v995_v35 = vrot.slane %v268_v19, %v12956_v14  ;;  %v271_v55 = vld [vmem:[%s12932_s26 + $0x120] sm:$0xff]  ;;  %v2479_v19 = vcombine.high %v2471_v8, %v2471_v8  ;;  %v2505_v33 = vrot.slane %v338_v18, %v12956_v14 }
  0xef   : > { %7240 = vmatpush1.xpose.msra.mxu0 %v2335_v39  ;;  %7234 = vmatmul.mubr.f32.vlgmr.msra.gmra.mrb[56].mxu1 %v917_v41  ;;  %v1005_v39 = vcombine.high %v269_v31, %v269_v31  ;;  %v2427_v41 = vrot.slane %v2413_v30, %v12956_v14  ;;  %v1004_v49 = vcombine.high %v1002_v38, %v1002_v38  ;;  %v339_v30 = vld [vmem:[%s12938_s5 + $0x140] sm:$0xff] }
  0xf0   : > { %7303 = vmatprep.mubr.f32.mxu0 %v935_v61  ;;  %7310 = vmatpush1.xpose.msra.mxu1 %v2342_v44  ;;  %v1012_v44 = vrot.slane %v269_v31, %v12956_v14  ;;  %v1003_v46 = vcombine.high %v995_v35, %v995_v35  ;;  %v2522_v45 = vrot.slane %v339_v30, %v12956_v14 }
  0xf1   : > { %7379 = vmatprep.subr.mxu0 %v2360_v62  ;;  %7373 = vmatprep.mubr.f32.mxu1 %v936_v0  ;;  %v2429_v52 = vcombine.high %v2427_v41, %v2427_v41 }
  0xf2   : > { %7304 = vmatmul.mubr.f32.vlgmr.msra.gmra.mrb[58].mxu0 %v927_v50  ;;  %7449 = vmatprep.subr.mxu1 %v2361_v3  ;;  %v1019_v50 = vrot.slane %v1005_v39, %v12956_v14  ;;  %v272_v3 = vld [vmem:[%s12932_s26 + $0x128] sm:$0xff]  ;;  %v2515_v39 = vcombine.high %v339_v30, %v339_v30 }
  0xf3   : > { %7380 = vmatpush1.xpose.msra.mxu0 %v2352_v51  ;;  %7374 = vmatmul.mubr.f32.vlgmr.msra.gmra.mrb[58].mxu1 %v934_v53  ;;  %v1022_v51 = vcombine.high %v270_v43, %v270_v43  ;;  %v2444_v53 = vrot.slane %v2430_v42, %v12956_v14  ;;  %v340_v42 = vld [vmem:[%s12938_s5 + $0x148] sm:$0xff] }
  0xf4   : > { %7443 = vmatprep.mubr.f32.mxu0 %v952_v7  ;;  %7450 = vmatpush1.xpose.msra.mxu1 %v2359_v56  ;;  %v1020_v56 = vcombine.high %v1012_v44, %v1012_v44  ;;  %v1021_v61 = vcombine.high %v1019_v50, %v1019_v50  ;;  %v2462_v7 = vcombine.high %v2454_v60, %v2454_v60 }
  0xf5   : > { %7519 = vmatprep.subr.mxu0 %v2377_v9  ;;  %7513 = vmatprep.mubr.f32.mxu1 %v953_v12  ;;  %v1036_v62 = vrot.slane %v1022_v51, %v12956_v14  ;;  %v2446_v0 = vcombine.high %v2444_v53, %v2444_v53  ;;  %v2532_v51 = vcombine.high %v340_v42, %v340_v42 }
  0xf6   : > { %7444 = vmatmul.mubr.f32.vlgmr.msra.gmra.mrb[60].mxu0 %v944_v59  ;;  %7589 = vmatprep.subr.mxu1 %v2378_v16  ;;  %v1029_v59 = vrot.slane %v270_v43, %v12956_v14  ;;  %v273_v16 = vld [vmem:[%s12932_s26 + $0x130] sm:$0xff]  ;;  %v2513_v43 = vcombine.high %v2505_v33, %v2505_v33  ;;  %v2539_v57 = vrot.slane %v340_v42, %v12956_v14 }
  0xf7   : > { %7520 = vmatpush1.xpose.msra.mxu0 %v2369_v63  ;;  %7514 = vmatmul.mubr.f32.vlgmr.msra.gmra.mrb[60].mxu1 %v951_v1  ;;  %v1039_v63 = vcombine.high %v271_v55, %v271_v55  ;;  %v2461_v1 = vrot.slane %v2447_v54, %v12956_v14  ;;  %v1038_v9 = vcombine.high %v1036_v62, %v1036_v62  ;;  %v341_v54 = vld [vmem:[%s12938_s5 + $0x150] sm:$0xff] }
  0xf8   : > { %7583 = vmatprep.mubr.f32.mxu0 %v969_v22  ;;  %7590 = vmatpush1.xpose.msra.mxu1 %v2376_v4  ;;  %v1046_v4 = vrot.slane %v271_v55, %v12956_v14  ;;  %v1037_v6 = vcombine.high %v1029_v59, %v1029_v59  ;;  %v2556_v5 = vrot.slane %v341_v54, %v12956_v14 }
  0xf9   : > { %7659 = vmatprep.subr.mxu0 %v2394_v23  ;;  %7653 = vmatprep.mubr.f32.mxu1 %v970_v25  ;;  %v2463_v12 = vcombine.high %v2461_v1, %v2461_v1 }
  0xfa   : > { %7584 = vmatmul.mubr.f32.vlgmr.msra.gmra.mrb[62].mxu0 %v961_v10  ;;  %7729 = vmatprep.subr.mxu1 %v2395_v28  ;;  %v1053_v10 = vrot.slane %v1039_v63, %v12956_v14  ;;  %v274_v28 = vld [vmem:[%s12932_s26 + $0x138] sm:$0xff]  ;;  %v2549_v63 = vcombine.high %v341_v54, %v341_v54 }
  0xfb   : > { %7660 = vmatpush1.xpose.msra.mxu0 %v2386_v11  ;;  %7654 = vmatmul.mubr.f32.vlgmr.msra.gmra.mrb[62].mxu1 %v968_v13  ;;  %v1056_v11 = vcombine.high %v272_v3, %v272_v3  ;;  %v2478_v13 = vrot.slane %v2464_v2, %v12956_v14  ;;  %v342_v2 = vld [vmem:[%s12938_s5 + $0x158] sm:$0xff] }
  0xfc   : > { %7723 = vmatprep.mubr.f32.mxu0 %v986_v32  ;;  %7730 = vmatpush1.xpose.msra.mxu1 %v2393_v17  ;;  %v1054_v17 = vcombine.high %v1046_v4, %v1046_v4  ;;  %v1055_v22 = vcombine.high %v1053_v10, %v1053_v10  ;;  %v2496_v32 = vcombine.high %v2488_v21, %v2488_v21 }
  0xfd   : > { %7799 = vmatprep.subr.mxu0 %v2411_v34  ;;  %7793 = vmatprep.mubr.f32.mxu1 %v987_v37  ;;  %v1070_v23 = vrot.slane %v1056_v11, %v12956_v14  ;;  %v2480_v25 = vcombine.high %v2478_v13, %v2478_v13  ;;  %v2566_v11 = vcombine.high %v342_v2, %v342_v2 }
  0xfe   : > { %7724 = vmatmul.mubr.f32.vlgmr.msra.gmra.mrb[64].mxu0 %v978_v20  ;;  %7869 = vmatprep.subr.mxu1 %v2412_v40  ;;  %v1063_v20 = vrot.slane %v272_v3, %v12956_v14  ;;  %v275_v40 = vld [vmem:[%s12932_s26 + $0x140] sm:$0xff]  ;;  %v2547_v3 = vcombine.high %v2539_v57, %v2539_v57  ;;  %v2573_v18 = vrot.slane %v342_v2, %v12956_v14 }
  0xff   : > { %7800 = vmatpush1.xpose.msra.mxu0 %v2403_v24  ;;  %7794 = vmatmul.mubr.f32.vlgmr.msra.gmra.mrb[64].mxu1 %v985_v26  ;;  %v1073_v24 = vcombine.high %v273_v16, %v273_v16  ;;  %v2495_v26 = vrot.slane %v2481_v15, %v12956_v14  ;;  %v1072_v34 = vcombine.high %v1070_v23, %v1070_v23  ;;  %v343_v15 = vld [vmem:[%s12938_s5 + $0x160] sm:$0xff] }
 0x100   : > { %7863 = vmatprep.mubr.f32.mxu0 %v1003_v46  ;;  %7870 = vmatpush1.xpose.msra.mxu1 %v2410_v29  ;;  %v1080_v29 = vrot.slane %v273_v16, %v12956_v14  ;;  %v1071_v31 = vcombine.high %v1063_v20, %v1063_v20  ;;  %v2590_v30 = vrot.slane %v343_v15, %v12956_v14 }
 0x101   : > { %7939 = vmatprep.subr.mxu0 %v2428_v47  ;;  %7933 = vmatprep.mubr.f32.mxu1 %v1004_v49  ;;  %v2497_v37 = vcombine.high %v2495_v26, %v2495_v26 }
 0x102   : > { %7864 = vmatmul.mubr.f32.vlgmr.msra.gmra.mrb[66].mxu0 %v995_v35  ;;  %8009 = vmatprep.subr.mxu1 %v2429_v52  ;;  %v1087_v35 = vrot.slane %v1073_v24, %v12956_v14  ;;  %v276_v52 = vld [vmem:[%s12932_s26 + $0x148] sm:$0xff]  ;;  %v2583_v24 = vcombine.high %v343_v15, %v343_v15 }
 0x103   : > { %7940 = vmatpush1.xpose.msra.mxu0 %v2420_v36  ;;  %7934 = vmatmul.mubr.f32.vlgmr.msra.gmra.mrb[66].mxu1 %v1002_v38  ;;  %v1090_v36 = vcombine.high %v274_v28, %v274_v28  ;;  %v2512_v38 = vrot.slane %v2498_v27, %v12956_v14  ;;  %v344_v27 = vld [vmem:[%s12938_s5 + $0x168] sm:$0xff] }
 0x104   : > { %8003 = vmatprep.mubr.f32.mxu0 %v1020_v56  ;;  %8010 = vmatpush1.xpose.msra.mxu1 %v2427_v41  ;;  %v1088_v41 = vcombine.high %v1080_v29, %v1080_v29  ;;  %v1089_v46 = vcombine.high %v1087_v35, %v1087_v35  ;;  %v2530_v56 = vcombine.high %v2522_v45, %v2522_v45 }
 0x105   : > { %8079 = vmatprep.subr.mxu0 %v2445_v58  ;;  %8073 = vmatprep.mubr.f32.mxu1 %v1021_v61  ;;  %v1104_v47 = vrot.slane %v1090_v36, %v12956_v14  ;;  %v2514_v49 = vcombine.high %v2512_v38, %v2512_v38  ;;  %v2600_v36 = vcombine.high %v344_v27, %v344_v27 }
 0x106   : > { %8004 = vmatmul.mubr.f32.vlgmr.msra.gmra.mrb[68].mxu0 %v1012_v44  ;;  %8149 = vmatprep.subr.mxu1 %v2446_v0  ;;  %v1097_v44 = vrot.slane %v274_v28, %v12956_v14  ;;  %v277_v0 = vld [vmem:[%s12932_s26 + $0x150] sm:$0xff]  ;;  %v2581_v28 = vcombine.high %v2573_v18, %v2573_v18  ;;  %v2607_v42 = vrot.slane %v344_v27, %v12956_v14 }
 0x107   : > { %8080 = vmatpush1.xpose.msra.mxu0 %v2437_v48  ;;  %8074 = vmatmul.mubr.f32.vlgmr.msra.gmra.mrb[68].mxu1 %v1019_v50  ;;  %v1107_v48 = vcombine.high %v275_v40, %v275_v40  ;;  %v2529_v50 = vrot.slane %v2515_v39, %v12956_v14  ;;  %v1106_v58 = vcombine.high %v1104_v47, %v1104_v47  ;;  %v345_v39 = vld [vmem:[%s12938_s5 + $0x170] sm:$0xff] }
 0x108   : > { %8143 = vmatprep.mubr.f32.mxu0 %v1037_v6  ;;  %8150 = vmatpush1.xpose.msra.mxu1 %v2444_v53  ;;  %v1114_v53 = vrot.slane %v275_v40, %v12956_v14  ;;  %v1105_v55 = vcombine.high %v1097_v44, %v1097_v44  ;;  %v2624_v54 = vrot.slane %v345_v39, %v12956_v14 }
 0x109   : > { %8219 = vmatprep.subr.mxu0 %v2462_v7  ;;  %8213 = vmatprep.mubr.f32.mxu1 %v1038_v9  ;;  %v2531_v61 = vcombine.high %v2529_v50, %v2529_v50 }
 0x10a   : > { %8144 = vmatmul.mubr.f32.vlgmr.msra.gmra.mrb[70].mxu0 %v1029_v59  ;;  %8289 = vmatprep.subr.mxu1 %v2463_v12  ;;  %v1121_v59 = vrot.slane %v1107_v48, %v12956_v14  ;;  %v278_v12 = vld [vmem:[%s12932_s26 + $0x158] sm:$0xff]  ;;  %v2617_v48 = vcombine.high %v345_v39, %v345_v39 }
 0x10b   : > { %8220 = vmatpush1.xpose.msra.mxu0 %v2454_v60  ;;  %8214 = vmatmul.mubr.f32.vlgmr.msra.gmra.mrb[70].mxu1 %v1036_v62  ;;  %v1124_v60 = vcombine.high %v276_v52, %v276_v52  ;;  %v2546_v62 = vrot.slane %v2532_v51, %v12956_v14  ;;  %v346_v51 = vld [vmem:[%s12938_s5 + $0x178] sm:$0xff] }
 0x10c   : > { %8283 = vmatprep.mubr.f32.mxu0 %v1054_v17  ;;  %8290 = vmatpush1.xpose.msra.mxu1 %v2461_v1  ;;  %v1122_v1 = vcombine.high %v1114_v53, %v1114_v53  ;;  %v1123_v6 = vcombine.high %v1121_v59, %v1121_v59  ;;  %v2564_v17 = vcombine.high %v2556_v5, %v2556_v5 }
 0x10d   : > { %8359 = vmatprep.subr.mxu0 %v2479_v19  ;;  %8353 = vmatprep.mubr.f32.mxu1 %v1055_v22  ;;  %v1138_v7 = vrot.slane %v1124_v60, %v12956_v14  ;;  %v2548_v9 = vcombine.high %v2546_v62, %v2546_v62  ;;  %v2634_v60 = vcombine.high %v346_v51, %v346_v51 }
 0x10e   : > { %8284 = vmatmul.mubr.f32.vlgmr.msra.gmra.mrb[72].mxu0 %v1046_v4  ;;  %8429 = vmatprep.subr.mxu1 %v2480_v25  ;;  %v1131_v4 = vrot.slane %v276_v52, %v12956_v14  ;;  %v279_v25 = vld [vmem:[%s12932_s26 + $0x160] sm:$0xff]  ;;  %v2615_v52 = vcombine.high %v2607_v42, %v2607_v42  ;;  %v2641_v2 = vrot.slane %v346_v51, %v12956_v14 }
 0x10f   : > { %8360 = vmatpush1.xpose.msra.mxu0 %v2471_v8  ;;  %8354 = vmatmul.mubr.f32.vlgmr.msra.gmra.mrb[72].mxu1 %v1053_v10  ;;  %v1141_v8 = vcombine.high %v277_v0, %v277_v0  ;;  %v2563_v10 = vrot.slane %v2549_v63, %v12956_v14  ;;  %v1140_v19 = vcombine.high %v1138_v7, %v1138_v7  ;;  %v347_v63 = vld [vmem:[%s12938_s5 + $0x180] sm:$0xff] }
 0x110   : > { %8423 = vmatprep.mubr.f32.mxu0 %v1071_v31  ;;  %8430 = vmatpush1.xpose.msra.mxu1 %v2478_v13  ;;  %v1148_v13 = vrot.slane %v277_v0, %v12956_v14  ;;  %v1139_v16 = vcombine.high %v1131_v4, %v1131_v4  ;;  %v2658_v15 = vrot.slane %v347_v63, %v12956_v14 }
 0x111   : > { %8499 = vmatprep.subr.mxu0 %v2496_v32  ;;  %8493 = vmatprep.mubr.f32.mxu1 %v1072_v34  ;;  %v2565_v22 = vcombine.high %v2563_v10, %v2563_v10 }
 0x112   : > { %8424 = vmatmul.mubr.f32.vlgmr.msra.gmra.mrb[74].mxu0 %v1063_v20  ;;  %8569 = vmatprep.subr.mxu1 %v2497_v37  ;;  %v1155_v20 = vrot.slane %v1141_v8, %v12956_v14  ;;  %v280_v37 = vld [vmem:[%s12932_s26 + $0x168] sm:$0xff]  ;;  %v2651_v8 = vcombine.high %v347_v63, %v347_v63 }
 0x113   : > { %8500 = vmatpush1.xpose.msra.mxu0 %v2488_v21  ;;  %8494 = vmatmul.mubr.f32.vlgmr.msra.gmra.mrb[74].mxu1 %v1070_v23  ;;  %v1158_v21 = vcombine.high %v278_v12, %v278_v12  ;;  %v2580_v23 = vrot.slane %v2566_v11, %v12956_v14  ;;  %v348_v11 = vld [vmem:[%s12938_s5 + $0x188] sm:$0xff] }
 0x114   : > { %8563 = vmatprep.mubr.f32.mxu0 %v1088_v41  ;;  %8570 = vmatpush1.xpose.msra.mxu1 %v2495_v26  ;;  %v1156_v26 = vcombine.high %v1148_v13, %v1148_v13  ;;  %v1157_v31 = vcombine.high %v1155_v20, %v1155_v20  ;;  %v2598_v41 = vcombine.high %v2590_v30, %v2590_v30 }
 0x115   : > { %8639 = vmatprep.subr.mxu0 %v2513_v43  ;;  %8633 = vmatprep.mubr.f32.mxu1 %v1089_v46  ;;  %v1172_v32 = vrot.slane %v1158_v21, %v12956_v14  ;;  %v2582_v34 = vcombine.high %v2580_v23, %v2580_v23  ;;  %v2668_v21 = vcombine.high %v348_v11, %v348_v11 }
 0x116   : > { %8564 = vmatmul.mubr.f32.vlgmr.msra.gmra.mrb[76].mxu0 %v1080_v29  ;;  %8709 = vmatprep.subr.mxu1 %v2514_v49  ;;  %v1165_v29 = vrot.slane %v278_v12, %v12956_v14  ;;  %v281_v49 = vld [vmem:[%s12932_s26 + $0x170] sm:$0xff]  ;;  %v2649_v12 = vcombine.high %v2641_v2, %v2641_v2  ;;  %v2675_v27 = vrot.slane %v348_v11, %v12956_v14 }
 0x117   : > { %8640 = vmatpush1.xpose.msra.mxu0 %v2505_v33  ;;  %8634 = vmatmul.mubr.f32.vlgmr.msra.gmra.mrb[76].mxu1 %v1087_v35  ;;  %v1175_v33 = vcombine.high %v279_v25, %v279_v25  ;;  %v2597_v35 = vrot.slane %v2583_v24, %v12956_v14  ;;  %v1174_v43 = vcombine.high %v1172_v32, %v1172_v32  ;;  %v349_v24 = vld [vmem:[%s12938_s5 + $0x190] sm:$0xff] }
 0x118   : > { %8703 = vmatprep.mubr.f32.mxu0 %v1105_v55  ;;  %8710 = vmatpush1.xpose.msra.mxu1 %v2512_v38  ;;  %v1182_v38 = vrot.slane %v279_v25, %v12956_v14  ;;  %v1173_v40 = vcombine.high %v1165_v29, %v1165_v29  ;;  %v2692_v39 = vrot.slane %v349_v24, %v12956_v14 }
 0x119   : > { %8779 = vmatprep.subr.mxu0 %v2530_v56  ;;  %8773 = vmatprep.mubr.f32.mxu1 %v1106_v58  ;;  %v2599_v46 = vcombine.high %v2597_v35, %v2597_v35 }
 0x11a   : > { %8704 = vmatmul.mubr.f32.vlgmr.msra.gmra.mrb[78].mxu0 %v1097_v44  ;;  %8849 = vmatprep.subr.mxu1 %v2531_v61  ;;  %v1189_v44 = vrot.slane %v1175_v33, %v12956_v14  ;;  %v282_v61 = vld [vmem:[%s12932_s26 + $0x178] sm:$0xff]  ;;  %v2685_v33 = vcombine.high %v349_v24, %v349_v24 }
 0x11b   : > { %8780 = vmatpush1.xpose.msra.mxu0 %v2522_v45  ;;  %8774 = vmatmul.mubr.f32.vlgmr.msra.gmra.mrb[78].mxu1 %v1104_v47  ;;  %v1192_v45 = vcombine.high %v280_v37, %v280_v37  ;;  %v2614_v47 = vrot.slane %v2600_v36, %v12956_v14  ;;  %v350_v36 = vld [vmem:[%s12938_s5 + $0x198] sm:$0xff] }
 0x11c   : > { %8843 = vmatprep.mubr.f32.mxu0 %v1122_v1  ;;  %8850 = vmatpush1.xpose.msra.mxu1 %v2529_v50  ;;  %v1190_v50 = vcombine.high %v1182_v38, %v1182_v38  ;;  %v1191_v55 = vcombine.high %v1189_v44, %v1189_v44  ;;  %v2632_v1 = vcombine.high %v2624_v54, %v2624_v54 }
 0x11d   : > { %8919 = vmatprep.subr.mxu0 %v2547_v3  ;;  %8913 = vmatprep.mubr.f32.mxu1 %v1123_v6  ;;  %v1206_v56 = vrot.slane %v1192_v45, %v12956_v14  ;;  %v2616_v58 = vcombine.high %v2614_v47, %v2614_v47  ;;  %v2702_v45 = vcombine.high %v350_v36, %v350_v36 }
 0x11e   : > { %8844 = vmatmul.mubr.f32.vlgmr.msra.gmra.mrb[80].mxu0 %v1114_v53  ;;  %8989 = vmatprep.subr.mxu1 %v2548_v9  ;;  %v1199_v53 = vrot.slane %v280_v37, %v12956_v14  ;;  %v283_v9 = vld [vmem:[%s12932_s26 + $0x180] sm:$0xff]  ;;  %v2683_v37 = vcombine.high %v2675_v27, %v2675_v27  ;;  %v2709_v51 = vrot.slane %v350_v36, %v12956_v14 }
 0x11f   : > { %8920 = vmatpush1.xpose.msra.mxu0 %v2539_v57  ;;  %8914 = vmatmul.mubr.f32.vlgmr.msra.gmra.mrb[80].mxu1 %v1121_v59  ;;  %v1209_v57 = vcombine.high %v281_v49, %v281_v49  ;;  %v2631_v59 = vrot.slane %v2617_v48, %v12956_v14  ;;  %v1208_v3 = vcombine.high %v1206_v56, %v1206_v56  ;;  %v351_v48 = vld [vmem:[%s12938_s5 + $0x1a0] sm:$0xff] }
 0x120   : > { %8983 = vmatprep.mubr.f32.mxu0 %v1139_v16  ;;  %8990 = vmatpush1.xpose.msra.mxu1 %v2546_v62  ;;  %v1216_v62 = vrot.slane %v281_v49, %v12956_v14  ;;  %v1207_v0 = vcombine.high %v1199_v53, %v1199_v53  ;;  %v2726_v63 = vrot.slane %v351_v48, %v12956_v14 }
 0x121   : > { %9059 = vmatprep.subr.mxu0 %v2564_v17  ;;  %9053 = vmatprep.mubr.f32.mxu1 %v1140_v19  ;;  %v2633_v6 = vcombine.high %v2631_v59, %v2631_v59 }
 0x122   : > { %8984 = vmatmul.mubr.f32.vlgmr.msra.gmra.mrb[82].mxu0 %v1131_v4  ;;  %9129 = vmatprep.subr.mxu1 %v2565_v22  ;;  %v1223_v4 = vrot.slane %v1209_v57, %v12956_v14  ;;  %v284_v22 = vld [vmem:[%s12932_s26 + $0x188] sm:$0xff]  ;;  %v2719_v57 = vcombine.high %v351_v48, %v351_v48 }
 0x123   : > { %9060 = vmatpush1.xpose.msra.mxu0 %v2556_v5  ;;  %9054 = vmatmul.mubr.f32.vlgmr.msra.gmra.mrb[82].mxu1 %v1138_v7  ;;  %v1226_v5 = vcombine.high %v282_v61, %v282_v61  ;;  %v2648_v7 = vrot.slane %v2634_v60, %v12956_v14  ;;  %v352_v60 = vld [vmem:[%s12938_s5 + $0x1a8] sm:$0xff] }
 0x124   : > { %9123 = vmatprep.mubr.f32.mxu0 %v1156_v26  ;;  %9130 = vmatpush1.xpose.msra.mxu1 %v2563_v10  ;;  %v1224_v10 = vcombine.high %v1216_v62, %v1216_v62  ;;  %v1225_v16 = vcombine.high %v1223_v4, %v1223_v4  ;;  %v2666_v26 = vcombine.high %v2658_v15, %v2658_v15 }
 0x125   : > { %9199 = vmatprep.subr.mxu0 %v2581_v28  ;;  %9193 = vmatprep.mubr.f32.mxu1 %v1157_v31  ;;  %v1240_v17 = vrot.slane %v1226_v5, %v12956_v14  ;;  %v2650_v19 = vcombine.high %v2648_v7, %v2648_v7  ;;  %v2736_v5 = vcombine.high %v352_v60, %v352_v60 }
 0x126   : > { %9124 = vmatmul.mubr.f32.vlgmr.msra.gmra.mrb[84].mxu0 %v1148_v13  ;;  %9269 = vmatprep.subr.mxu1 %v2582_v34  ;;  %v1233_v13 = vrot.slane %v282_v61, %v12956_v14  ;;  %v285_v34 = vld [vmem:[%s12932_s26 + $0x190] sm:$0xff]  ;;  %v2717_v61 = vcombine.high %v2709_v51, %v2709_v51  ;;  %v2743_v11 = vrot.slane %v352_v60, %v12956_v14 }
 0x127   : > { %9200 = vmatpush1.xpose.msra.mxu0 %v2573_v18  ;;  %9194 = vmatmul.mubr.f32.vlgmr.msra.gmra.mrb[84].mxu1 %v1155_v20  ;;  %v1243_v18 = vcombine.high %v283_v9, %v283_v9  ;;  %v2665_v20 = vrot.slane %v2651_v8, %v12956_v14  ;;  %v1242_v28 = vcombine.high %v1240_v17, %v1240_v17  ;;  %v353_v8 = vld [vmem:[%s12938_s5 + $0x1b0] sm:$0xff] }
 0x128   : > { %9263 = vmatprep.mubr.f32.mxu0 %v1173_v40  ;;  %9270 = vmatpush1.xpose.msra.mxu1 %v2580_v23  ;;  %v1250_v23 = vrot.slane %v283_v9, %v12956_v14  ;;  %v1241_v25 = vcombine.high %v1233_v13, %v1233_v13  ;;  %v2760_v24 = vrot.slane %v353_v8, %v12956_v14 }
 0x129   : > { %9339 = vmatprep.subr.mxu0 %v2598_v41  ;;  %9333 = vmatprep.mubr.f32.mxu1 %v1174_v43  ;;  %v2667_v31 = vcombine.high %v2665_v20, %v2665_v20 }
 0x12a   : > { %9264 = vmatmul.mubr.f32.vlgmr.msra.gmra.mrb[86].mxu0 %v1165_v29  ;;  %9409 = vmatprep.subr.mxu1 %v2599_v46  ;;  %v1257_v29 = vrot.slane %v1243_v18, %v12956_v14  ;;  %v286_v46 = vld [vmem:[%s12932_s26 + $0x198] sm:$0xff]  ;;  %v2750_v18 = vrot.slane %v2736_v5, %v12956_v14 }
 0x12b   : > { %9340 = vmatpush1.xpose.msra.mxu0 %v2590_v30  ;;  %9334 = vmatmul.mubr.f32.vlgmr.msra.gmra.mrb[86].mxu1 %v1172_v32  ;;  %v1260_v30 = vcombine.high %v284_v22, %v284_v22  ;;  %v2682_v32 = vrot.slane %v2668_v21, %v12956_v14 }
 0x12c   : > { %9403 = vmatprep.mubr.f32.mxu0 %v1190_v50  ;;  %9410 = vmatpush1.xpose.msra.mxu1 %v2597_v35  ;;  %v1258_v35 = vcombine.high %v1250_v23, %v1250_v23  ;;  %v1259_v40 = vcombine.high %v1257_v29, %v1257_v29  ;;  %v2700_v50 = vcombine.high %v2692_v39, %v2692_v39 }
 0x12d   : > { %9479 = vmatprep.subr.mxu0 %v2615_v52  ;;  %9473 = vmatprep.mubr.f32.mxu1 %v1191_v55  ;;  %v1274_v41 = vrot.slane %v1260_v30, %v12956_v14  ;;  %v2684_v43 = vcombine.high %v2682_v32, %v2682_v32 }
 0x12e   : > { %9404 = vmatmul.mubr.f32.vlgmr.msra.gmra.mrb[88].mxu0 %v1182_v38  ;;  %9549 = vmatprep.subr.mxu1 %v2616_v58  ;;  %v1267_v38 = vrot.slane %v284_v22, %v12956_v14  ;;  %v287_v58 = vld [vmem:[%s12932_s26 + $0x1a0] sm:$0xff] }
 0x12f   : > { %9480 = vmatpush1.xpose.msra.mxu0 %v2607_v42  ;;  %9474 = vmatmul.mubr.f32.vlgmr.msra.gmra.mrb[88].mxu1 %v1189_v44  ;;  %v1277_v42 = vcombine.high %v285_v34, %v285_v34  ;;  %v2699_v44 = vrot.slane %v2685_v33, %v12956_v14  ;;  %v1276_v52 = vcombine.high %v1274_v41, %v1274_v41 }
 0x130   : > { %9543 = vmatprep.mubr.f32.mxu0 %v1207_v0  ;;  %9550 = vmatpush1.xpose.msra.mxu1 %v2614_v47  ;;  %v1284_v47 = vrot.slane %v285_v34, %v12956_v14  ;;  %v1275_v49 = vcombine.high %v1267_v38, %v1267_v38  ;;  %v355_v34 = vld [vmem:[%s12938_s5 + $0x1c0] sm:$0xff] }
 0x131   : > { %9619 = vmatprep.subr.mxu0 %v2632_v1  ;;  %9613 = vmatprep.mubr.f32.mxu1 %v1208_v3  ;;  %v2701_v55 = vcombine.high %v2699_v44, %v2699_v44 }
 0x132   : > { %9544 = vmatmul.mubr.f32.vlgmr.msra.gmra.mrb[90].mxu0 %v1199_v53  ;;  %9689 = vmatprep.subr.mxu1 %v2633_v6  ;;  %v1291_v53 = vrot.slane %v1277_v42, %v12956_v14  ;;  %v288_v6 = vld [vmem:[%s12932_s26 + $0x1a8] sm:$0xff]  ;;  %v2787_v42 = vcombine.high %v355_v34, %v355_v34 }
 0x133   : > { %9620 = vmatpush1.xpose.msra.mxu0 %v2624_v54  ;;  %9614 = vmatmul.mubr.f32.vlgmr.msra.gmra.mrb[90].mxu1 %v1206_v56  ;;  %v1294_v54 = vcombine.high %v286_v46, %v286_v46  ;;  %v2716_v56 = vrot.slane %v2702_v45, %v12956_v14  ;;  %v1335_v22 = vrot.slane %v288_v6, %v12956_v14 }
 0x134   : > { %9683 = vmatprep.mubr.f32.mxu0 %v1224_v10  ;;  %9690 = vmatpush1.xpose.msra.mxu1 %v2631_v59  ;;  %v1292_v59 = vcombine.high %v1284_v47, %v1284_v47  ;;  %v1293_v0 = vcombine.high %v1291_v53, %v1291_v53  ;;  %v2734_v10 = vcombine.high %v2726_v63, %v2726_v63 }
 0x135   : > { %9759 = vmatprep.subr.mxu0 %v2649_v12  ;;  %9753 = vmatprep.mubr.f32.mxu1 %v1225_v16  ;;  %v1308_v1 = vrot.slane %v1294_v54, %v12956_v14  ;;  %v2718_v3 = vcombine.high %v2716_v56, %v2716_v56  ;;  %v289_v16 = vld [vmem:[%s12932_s26 + $0x1b0] sm:$0xff] }
 0x136   : > { %9684 = vmatmul.mubr.f32.vlgmr.msra.gmra.mrb[92].mxu0 %v1216_v62  ;;  %9829 = vmatprep.subr.mxu1 %v2650_v19  ;;  %v1301_v62 = vrot.slane %v286_v46, %v12956_v14  ;;  %v2753_v19 = vcombine.high %v353_v8, %v353_v8  ;;  %v1352_v33 = vrot.slane %v289_v16, %v12956_v14  ;;  %v356_v46 = vld [vmem:[%s12938_s5 + $0x1c8] sm:$0xff] }
 0x137   : > { %9760 = vmatpush1.xpose.msra.mxu0 %v2641_v2  ;;  %9754 = vmatmul.mubr.f32.vlgmr.msra.gmra.mrb[92].mxu1 %v1223_v4  ;;  %v1311_v2 = vcombine.high %v287_v58, %v287_v58  ;;  %v2733_v4 = vrot.slane %v2719_v57, %v12956_v14  ;;  %v1310_v12 = vcombine.high %v1308_v1, %v1308_v1 }
 0x138   : > { %9823 = vmatprep.mubr.f32.mxu0 %v1241_v25  ;;  %9830 = vmatpush1.xpose.msra.mxu1 %v2648_v7  ;;  %v1318_v7 = vrot.slane %v287_v58, %v12956_v14  ;;  %v1309_v9 = vcombine.high %v1301_v62, %v1301_v62  ;;  %v1345_v25 = vcombine.high %v289_v16, %v289_v16 }
 0x139   : > { %9899 = vmatprep.subr.mxu0 %v2666_v26  ;;  %9893 = vmatprep.mubr.f32.mxu1 %v1242_v28  ;;  %v2767_v30 = vrot.slane %v2753_v19, %v12956_v14  ;;  %v2804_v60 = vcombine.high %v356_v46, %v356_v46 }
 0x13a   : > { %9824 = vmatmul.mubr.f32.vlgmr.msra.gmra.mrb[94].mxu0 %v1233_v13  ;;  %9969 = vmatprep.subr.mxu1 %v2667_v31  ;;  %v1325_v13 = vrot.slane %v1311_v2, %v12956_v14  ;;  %v1326_v21 = vcombine.high %v1318_v7, %v1318_v7  ;;  %v290_v31 = vld [vmem:[%s12932_s26 + $0x1b8] sm:$0xff] }
 0x13b   : > { %9900 = vmatpush1.xpose.msra.mxu0 %v2658_v15  ;;  %9894 = vmatmul.mubr.f32.vlgmr.msra.gmra.mrb[94].mxu1 %v1240_v17  ;;  %v1328_v15 = vcombine.high %v288_v6, %v288_v6  ;;  %v2735_v17 = vcombine.high %v2733_v4, %v2733_v4  ;;  %v13292_v45 = vrot.slane %v290_v31, %v12956_v14 }
 0x13c   : > { %9963 = vmatprep.mubr.f32.mxu0 %v1258_v35  ;;  %9970 = vmatpush1.xpose.msra.mxu1 %v2665_v20  ;;  %v354_v20 = vld [vmem:[%s12938_s5 + $0x1b8] sm:$0xff]  ;;  %v1327_v26 = vcombine.high %v1325_v13, %v1325_v13  ;;  %v2768_v35 = vcombine.high %v2760_v24, %v2760_v24 }
 0x13d   : > { %10039 = vmatprep.subr.mxu0 %v2683_v37  ;;  %10033 = vmatprep.mubr.f32.mxu1 %v1259_v40  ;;  %v2770_v28 = vcombine.high %v354_v20, %v354_v20  ;;  %v2777_v36 = vrot.slane %v354_v20, %v12956_v14  ;;  %v1359_v37 = vrot.slane %v1345_v25, %v12956_v14 }
 0x13e   : > { %9964 = vmatmul.mubr.f32.vlgmr.msra.gmra.mrb[96].mxu0 %v1250_v23  ;;  %10109 = vmatprep.subr.mxu1 %v2684_v43  ;;  %v2751_v23 = vcombine.high %v2743_v11, %v2743_v11  ;;  %v1362_v40 = vcombine.high %v290_v31, %v290_v31  ;;  %v291_v43 = vld [vmem:[%s12932_s26 + $0x1c0] sm:$0xff]  ;;  %v294_v31 = vld [vmem:[%s12932_s26 + $0x1d8] sm:$0xff] }
 0x13f   : > { %10040 = vmatpush1.xpose.msra.mxu0 %v2675_v27  ;;  %10034 = vmatmul.mubr.f32.vlgmr.msra.gmra.mrb[96].mxu1 %v1257_v29  ;;  %v1342_v27 = vrot.slane %v1328_v15, %v12956_v14  ;;  %v2752_v29 = vcombine.high %v2750_v18, %v2750_v18  ;;  %v1361_v48 = vcombine.high %v1359_v37, %v1359_v37 }
 0x140   : > { %10103 = vmatprep.mubr.f32.mxu0 %v1275_v49  ;;  %10110 = vmatpush1.xpose.msra.mxu1 %v2682_v32  ;;  %v1343_v32 = vcombine.high %v1335_v22, %v1335_v22  ;;  %v13296_v49 = vrot.slane %v355_v34, %v12956_v14  ;;  %v1379_v54 = vcombine.high %v291_v43, %v291_v43 }
 0x141   : > { %10179 = vmatprep.subr.mxu0 %v2700_v50  ;;  %10173 = vmatprep.mubr.f32.mxu1 %v1276_v52 }
 0x142   : > { %10104 = vmatmul.mubr.f32.vlgmr.msra.gmra.mrb[98].mxu0 %v1267_v38  ;;  %10249 = vmatprep.subr.mxu1 %v2701_v55  ;;  %v1344_v38 = vcombine.high %v1342_v27, %v1342_v27  ;;  %v292_v55 = vld [vmem:[%s12932_s26 + $0x1c8] sm:$0xff]  ;;  %v13315_v5 = vrot.slane %v1379_v54, %v12956_v14 }
 0x143   : > { %10180 = vmatpush1.xpose.msra.mxu0 %v2692_v39  ;;  %10174 = vmatmul.mubr.f32.vlgmr.msra.gmra.mrb[98].mxu1 %v1274_v41  ;;  %v13288_v39 = vrot.slane %v2770_v28, %v12956_v14  ;;  %v2769_v41 = vcombine.high %v2767_v30, %v2767_v30  ;;  %v1396_v2 = vcombine.high %v292_v55, %v292_v55 }
 0x144   : > { %10243 = vmatprep.mubr.f32.mxu0 %v1292_v59  ;;  %10250 = vmatpush1.xpose.msra.mxu1 %v2699_v44  ;;  %v1360_v44 = vcombine.high %v1352_v33, %v1352_v33  ;;  %v2801_v59 = vrot.slane %v2787_v42, %v12956_v14  ;;  %v13322_v16 = vrot.slane %v292_v55, %v12956_v14 }
 0x145   : > { %10319 = vmatprep.subr.mxu0 %v2717_v61  ;;  %10313 = vmatprep.mubr.f32.mxu1 %v1293_v0  ;;  %v2786_v52 = vcombine.high %v13288_v39, %v13288_v39  ;;  %v357_v61 = vld [vmem:[%s12938_s5 + $0x1d0] sm:$0xff]  ;;  %v2802_v0 = vcombine.high %v13296_v49, %v13296_v49 }
 0x146   : > { %10244 = vmatmul.mubr.f32.vlgmr.msra.gmra.mrb[100].mxu0 %v1284_v47  ;;  %10389 = vmatprep.subr.mxu1 %v2718_v3  ;;  %v2785_v47 = vcombine.high %v2777_v36, %v2777_v36  ;;  %v2821_v6 = vcombine.high %v357_v61, %v357_v61 }
 0x147   : > { %10320 = vmatpush1.xpose.msra.mxu0 %v2709_v51  ;;  %10314 = vmatmul.mubr.f32.vlgmr.msra.gmra.mrb[100].mxu1 %v1291_v53  ;;  %v1376_v53 = vrot.slane %v1362_v40, %v12956_v14 }
 0x148   : > { %10383 = vmatprep.mubr.f32.mxu0 %v1309_v9  ;;  %10390 = vmatpush1.xpose.msra.mxu1 %v2716_v56 }
 0x149   : > { %10459 = vmatprep.subr.mxu0 %v2734_v10  ;;  %10453 = vmatprep.mubr.f32.mxu1 %v1310_v12  ;;  %v2803_v10 = vcombine.high %v2801_v59, %v2801_v59  ;;  %v293_v12 = vld [vmem:[%s12932_s26 + $0x1d0] sm:$0xff] }
 0x14a   : > { %10384 = vmatmul.mubr.f32.vlgmr.msra.gmra.mrb[102].mxu0 %v1301_v62  ;;  %10529 = vmatprep.subr.mxu1 %v2735_v17  ;;  %v1377_v62 = vcombine.high %v13292_v45, %v13292_v45  ;;  %v13325_v17 = vrot.slane %v357_v61, %v12956_v14  ;;  %v1413_v25 = vcombine.high %v293_v12, %v293_v12 }
 0x14b   : > { %10460 = vmatpush1.xpose.msra.mxu0 %v2726_v63  ;;  %10454 = vmatmul.mubr.f32.vlgmr.msra.gmra.mrb[102].mxu1 %v1308_v1  ;;  %v13307_v63 = vrot.slane %v291_v43, %v12956_v14  ;;  %v13312_v1 = vrot.slane %v356_v46, %v12956_v14  ;;  %v1430_v43 = vcombine.high %v294_v31, %v294_v31 }
 0x14c   : > { %10523 = vmatprep.mubr.f32.mxu0 %v1326_v21  ;;  %10530 = vmatpush1.xpose.msra.mxu1 %v2733_v4  ;;  %v1378_v4 = vcombine.high %v1376_v53, %v1376_v53  ;;  %v13332_v21 = vrot.slane %v1396_v2, %v12956_v14  ;;  %v2836_v34 = vcombine.high %v13325_v17, %v13325_v17 }
 0x14d   : > { %10599 = vmatprep.subr.mxu0 %v2751_v23  ;;  %10593 = vmatprep.mubr.f32.mxu1 %v1327_v26  ;;  %v1394_v15 = vcombine.high %v13307_v63, %v13307_v63  ;;  %v2819_v20 = vcombine.high %v13312_v1, %v13312_v1  ;;  %v1395_v23 = vcombine.high %v13315_v5, %v13315_v5 }
 0x14e   : > { %10524 = vmatmul.mubr.f32.vlgmr.msra.gmra.mrb[104].mxu0 %v1318_v7  ;;  %10669 = vmatprep.subr.mxu1 %v2752_v29  ;;  %v13358_v42 = vrot.slane %v1413_v25, %v12956_v14 }
 0x14f   : > { %10600 = vmatpush1.xpose.msra.mxu0 %v2743_v11  ;;  %10594 = vmatmul.mubr.f32.vlgmr.msra.gmra.mrb[104].mxu1 %v1325_v13  ;;  %v2818_v11 = vrot.slane %v2804_v60, %v12956_v14  ;;  %v13379_v60 = vrot.slane %v1430_v43, %v12956_v14 }
 0x150   : > { %10663 = vmatprep.mubr.f32.mxu0 %v1343_v32  ;;  %10670 = vmatpush1.xpose.msra.mxu1 %v2750_v18  ;;  %v358_v18 = vld [vmem:[%s12938_s5 + $0x1d8] sm:$0xff] }
 0x151   : > { %v3245_v50 = vpop.f32.mrb[0].mxu0  ;;  %v3315_v51 = vpop.f32.mrb[0].mxu1  ;;  %10739 = vmatprep.subr.mxu0 %v2768_v35  ;;  %10733 = vmatprep.mubr.f32.mxu1 %v1344_v38  ;;  %v2820_v29 = vcombine.high %v2818_v11, %v2818_v11  ;;  %v13347_v35 = vrot.slane %v293_v12, %v12956_v14  ;;  %v1412_v38 = vcombine.high %v13332_v21, %v13332_v21 }
 0x152   : > { %v3247_v56 = vpop.f32.mrb[1].mxu0  ;;  %v3316_v57 = vadd.f32 %v3315_v51, %v3245_v50  ;;  %10664 = vmatmul.mubr.f32.vlgmr.msra.gmra.mrb[106].mxu0 %v1335_v22  ;;  %v3317_v58 = vpop.f32.mrb[1].mxu1  ;;  %10809 = vmatprep.subr.mxu1 %v2769_v41  ;;  %v360_v50 = vld [vmem:[%s12938_s5 + $0x1e8] sm:$0xff] }
 0x153   : > { %10740 = vmatpush1.xpose.msra.mxu0 %v2760_v24  ;;  %10734 = vmatmul.mubr.f32.vlgmr.msra.gmra.mrb[106].mxu1 %v1342_v27  ;;  %v13337_v24 = vrot.slane %v2821_v6, %v12956_v14  ;;  %v2872_v61 = vcombine.high %v360_v50, %v360_v50 }
 0x154   : > { %10803 = vmatprep.mubr.f32.mxu0 %v1360_v44  ;;  %10810 = vmatpush1.xpose.msra.mxu1 %v2767_v30  ;;  %v2838_v30 = vcombine.high %v358_v18, %v358_v18  ;;  %v295_v44 = vld [vmem:[%s12932_s26 + $0x1e0] sm:$0xff] }
 0x155   : > { %v3385_v3 = vpop.f32.mrb[2].mxu0  ;;  %10879 = vmatprep.subr.mxu0 %v2785_v47  ;;  %10873 = vmatprep.mubr.f32.mxu1 %v1361_v48  ;;  %v2837_v41 = vcombine.high %v13337_v24, %v13337_v24 }
 0x156   : > { %v3386_v7 = vadd.f32 %v3385_v3, %v3316_v57  ;;  %v3387_v8 = vpop.f32.mrb[3].mxu0  ;;  %10804 = vmatmul.mubr.f32.vlgmr.msra.gmra.mrb[108].mxu0 %v1352_v33  ;;  %v3455_v9 = vpop.f32.mrb[2].mxu1  ;;  %10949 = vmatprep.subr.mxu1 %v2786_v52  ;;  %v1411_v33 = vcombine.high %v13322_v16, %v13322_v16  ;;  %v2852_v48 = vrot.slane %v2838_v30, %v12956_v14  ;;  %v296_v3 = vld [vmem:[%s12932_s26 + $0x1e8] sm:$0xff] }
 0x157   : > { %10880 = vmatpush1.xpose.msra.mxu0 %v2777_v36  ;;  %v3457_v13 = vpop.f32.mrb[3].mxu1  ;;  %10874 = vmatmul.mubr.f32.vlgmr.msra.gmra.mrb[108].mxu1 %v1359_v37  ;;  %v359_v36 = vld [vmem:[%s12938_s5 + $0x1e0] sm:$0xff]  ;;  %v1428_v52 = vcombine.high %v13347_v35, %v13347_v35  ;;  %v1447_v57 = vcombine.high %v295_v44, %v295_v44  ;;  %v361_v8 = vld [vmem:[%s12938_s5 + $0x1f0] sm:$0xff]  ;;  %v1471_v25 = vrot.slane %v296_v3, %v12956_v14 }
 0x158   : > { %v3456_v19 = vadd.f32 %v3455_v9, %v3386_v7  ;;  %10943 = vmatprep.mubr.f32.mxu0 %v1377_v62  ;;  %10950 = vmatpush1.xpose.msra.mxu1 %v13288_v39  ;;  %v13353_v39 = vrot.slane %v358_v18, %v12956_v14  ;;  %v13372_v54 = vrot.slane %v359_v36, %v12956_v14 }
 0x159   : > { %v3525_v22 = vpop.f32.mrb[4].mxu0  ;;  %11019 = vmatprep.subr.mxu0 %v2802_v0  ;;  %11013 = vmatprep.mubr.f32.mxu1 %v1378_v4  ;;  %v13391_v7 = vrot.slane %v295_v44, %v12956_v14  ;;  %v1446_v13 = vcombine.high %v13379_v60, %v13379_v60 }
 0x15a   : > { %v3526_v26 = vadd.f32 %v3525_v22, %v3456_v19  ;;  %v3527_v27 = vpop.f32.mrb[5].mxu0  ;;  %10944 = vmatmul.mubr.f32.vlgmr.msra.gmra.mrb[110].mxu0 %v13292_v45  ;;  %v3595_v28 = vpop.f32.mrb[4].mxu1  ;;  %11089 = vmatprep.subr.mxu1 %v2803_v10  ;;  %v2853_v56 = vcombine.high %v13353_v39, %v13353_v39  ;;  %v2870_v6 = vcombine.high %v13372_v54, %v13372_v54  ;;  %v297_v22 = vld [vmem:[%s12932_s26 + $0x1f0] sm:$0xff] }
 0x15b   : > { %11020 = vmatpush1.xpose.msra.mxu0 %v13296_v49  ;;  %v3597_v32 = vpop.f32.mrb[5].mxu1  ;;  %11014 = vmatmul.mubr.f32.vlgmr.msra.gmra.mrb[110].mxu1 %v1376_v53  ;;  %v2855_v49 = vcombine.high %v359_v36, %v359_v36  ;;  %v13369_v53 = vrot.slane %v294_v31, %v12956_v14  ;;  %v13396_v10 = vrot.slane %v360_v50, %v12956_v14  ;;  %v362_v27 = vld [vmem:[%s12938_s5 + $0x1f8] sm:$0xff] }
 0x15c   : > { %v3596_v37 = vadd.f32 %v3595_v28, %v3526_v26  ;;  %11083 = vmatprep.mubr.f32.mxu0 %v1394_v15  ;;  %11090 = vmatpush1.xpose.msra.mxu1 %v2801_v59  ;;  %v1429_v59 = vcombine.high %v13358_v42, %v13358_v42  ;;  %v13404_v15 = vrot.slane %v2872_v61, %v12956_v14 }
 0x15d   : > { %v3665_v40 = vpop.f32.mrb[6].mxu0  ;;  %11159 = vmatprep.subr.mxu0 %v2819_v20  ;;  %11153 = vmatprep.mubr.f32.mxu1 %v1395_v23  ;;  %v2869_v2 = vrot.slane %v2855_v49, %v12956_v14  ;;  %v13414_v26 = vrot.slane %v361_v8, %v12956_v14 }
 0x15e   : > { %v3666_v45 = vadd.f32 %v3665_v40, %v3596_v37  ;;  %v3667_v46 = vpop.f32.mrb[7].mxu0  ;;  %11084 = vmatmul.mubr.f32.vlgmr.msra.gmra.mrb[112].mxu0 %v13307_v63  ;;  %v3735_v47 = vpop.f32.mrb[6].mxu1  ;;  %11229 = vmatprep.subr.mxu1 %v2820_v29  ;;  %v2887_v29 = vcombine.high %v13396_v10, %v13396_v10  ;;  %v2888_v32 = vcombine.high %v13404_v15, %v13404_v15  ;;  %v298_v40 = vld [vmem:[%s12932_s26 + $0x1f8] sm:$0xff] }
 0x15f   : > { %11160 = vmatpush1.xpose.msra.mxu0 %v13312_v1  ;;  %v3737_v51 = vpop.f32.mrb[7].mxu1  ;;  %11154 = vmatmul.mubr.f32.vlgmr.msra.gmra.mrb[112].mxu1 %v13315_v5  ;;  %v2854_v1 = vcombine.high %v2852_v48, %v2852_v48  ;;  %v1445_v5 = vcombine.high %v13369_v53, %v13369_v53  ;;  %v2871_v20 = vcombine.high %v2869_v2, %v2869_v2 }
 0x160   : > { %v3736_v55 = vadd.f32 %v3735_v47, %v3666_v45  ;;  %11223 = vmatprep.mubr.f32.mxu0 %v1411_v33  ;;  %11230 = vmatpush1.xpose.msra.mxu1 %v2818_v11  ;;  %v13399_v11 = vrot.slane %v1447_v57, %v12956_v14  ;;  %v2904_v43 = vcombine.high %v13414_v26, %v13414_v26 }
 0x161   : > { %v3805_v58 = vpop.f32.mrb[8].mxu0  ;;  %11299 = vmatprep.subr.mxu0 %v2836_v34  ;;  %11293 = vmatprep.mubr.f32.mxu1 %v1412_v38  ;;  %v1481_v34 = vcombine.high %v297_v22, %v297_v22  ;;  %v1488_v45 = vrot.slane %v297_v22, %v12956_v14  ;;  %v2913_v46 = vrot.slane %v362_v27, %v12956_v14 }
 0x162   : > { %v3806_v62 = vadd.f32 %v3805_v58, %v3736_v55  ;;  %v3807_v63 = vpop.f32.mrb[9].mxu0  ;;  %11224 = vmatmul.mubr.f32.vlgmr.msra.gmra.mrb[114].mxu0 %v13322_v16  ;;  %v3875_v0 = vpop.f32.mrb[8].mxu1  ;;  %11369 = vmatprep.subr.mxu1 %v2837_v41  ;;  %v1464_v16 = vcombine.high %v296_v3, %v296_v3  ;;  %v1463_v30 = vcombine.high %v13399_v11, %v13399_v11 }
 0x163   : > { %11300 = vmatpush1.xpose.msra.mxu0 %v13325_v17  ;;  %v3877_v4 = vpop.f32.mrb[9].mxu1  ;;  %11294 = vmatmul.mubr.f32.vlgmr.msra.gmra.mrb[114].mxu1 %v13332_v21  ;;  %v2889_v21 = vcombine.high %v361_v8, %v361_v8  ;;  %v1495_v49 = vrot.slane %v1481_v34, %v12956_v14  ;;  %v1498_v50 = vcombine.high %v298_v40, %v298_v40 }
 0x164   : > { %v3876_v9 = vadd.f32 %v3875_v0, %v3806_v62  ;;  %11363 = vmatprep.mubr.f32.mxu0 %v1428_v52  ;;  %11370 = vmatpush1.xpose.msra.mxu1 %v13337_v24  ;;  %v1462_v24 = vcombine.high %v13391_v7, %v13391_v7  ;;  %v1478_v33 = vrot.slane %v1464_v16, %v12956_v14 }
 0x165   : > { %v3945_v12 = vpop.f32.mrb[10].mxu0  ;;  %11439 = vmatprep.subr.mxu0 %v2853_v56  ;;  %11433 = vmatprep.mubr.f32.mxu1 %v1429_v59  ;;  %v2903_v38 = vrot.slane %v2889_v21, %v12956_v14  ;;  %v1496_v58 = vcombine.high %v1488_v45, %v1488_v45  ;;  %v1505_v59 = vrot.slane %v298_v40, %v12956_v14 }
 0x166   : > { %v3946_v17 = vadd.f32 %v3945_v12, %v3876_v9  ;;  %v3947_v18 = vpop.f32.mrb[11].mxu0  ;;  %11364 = vmatmul.mubr.f32.vlgmr.msra.gmra.mrb[116].mxu0 %v13347_v35  ;;  %v4015_v19 = vpop.f32.mrb[10].mxu1  ;;  %11509 = vmatprep.subr.mxu1 %v2854_v1  ;;  %v2921_v61 = vcombine.high %v2913_v46, %v2913_v46  ;;  %v1497_v62 = vcombine.high %v1495_v49, %v1495_v49 }
 0x167   : > { %11440 = vmatpush1.xpose.msra.mxu0 %v13353_v39  ;;  %v4017_v23 = vpop.f32.mrb[11].mxu1  ;;  %11434 = vmatmul.mubr.f32.vlgmr.msra.gmra.mrb[116].mxu1 %v13358_v42  ;;  %v2906_v39 = vcombine.high %v362_v27, %v362_v27  ;;  %v1479_v42 = vcombine.high %v1471_v25, %v1471_v25  ;;  %v1512_v63 = vrot.slane %v1498_v50, %v12956_v14 }
 0x168   : > { %v4016_v28 = vadd.f32 %v4015_v19, %v3946_v17  ;;  %11503 = vmatprep.mubr.f32.mxu0 %v1445_v5  ;;  %11510 = vmatpush1.xpose.msra.mxu1 %v2852_v48  ;;  %v1480_v48 = vcombine.high %v1478_v33, %v1478_v33 }
 0x169   : > { %v4085_v31 = vpop.f32.mrb[12].mxu0  ;;  %11579 = vmatprep.subr.mxu0 %v2870_v6  ;;  %11573 = vmatprep.mubr.f32.mxu1 %v1446_v13  ;;  %v2920_v55 = vrot.slane %v2906_v39, %v12956_v14  ;;  %v1513_v6 = vcombine.high %v1505_v59, %v1505_v59  ;;  %v1514_v8 = vcombine.high %v1512_v63, %v1512_v63 }
 0x16a   : > { %v4086_v35 = vadd.f32 %v4085_v31, %v4016_v28  ;;  %v4087_v36 = vpop.f32.mrb[13].mxu0  ;;  %11504 = vmatmul.mubr.f32.vlgmr.msra.gmra.mrb[118].mxu0 %v13369_v53  ;;  %v4155_v37 = vpop.f32.mrb[12].mxu1  ;;  %11649 = vmatprep.subr.mxu1 %v2871_v20 }
 0x16b   : > { %11580 = vmatpush1.xpose.msra.mxu0 %v13372_v54  ;;  %v4157_v41 = vpop.f32.mrb[13].mxu1  ;;  %11574 = vmatmul.mubr.f32.vlgmr.msra.gmra.mrb[118].mxu1 %v13379_v60  ;;  %v2905_v54 = vcombine.high %v2903_v38, %v2903_v38  ;;  %v2922_v3 = vcombine.high %v2920_v55, %v2920_v55 }
 0x16c   : > { %v4156_v44 = vadd.f32 %v4155_v37, %v4086_v35  ;;  %11643 = vmatprep.mubr.f32.mxu0 %v1462_v24  ;;  %11650 = vmatpush1.xpose.msra.mxu1 %v2869_v2 }
 0x16d   : > { %v4225_v47 = vpop.f32.mrb[14].mxu0  ;;  %11719 = vmatprep.subr.mxu0 %v2887_v29  ;;  %11713 = vmatprep.mubr.f32.mxu1 %v1463_v30 }
 0x16e   : > { %v4226_v51 = vadd.f32 %v4225_v47, %v4156_v44  ;;  %v4227_v52 = vpop.f32.mrb[15].mxu0  ;;  %11644 = vmatmul.mubr.f32.vlgmr.msra.gmra.mrb[120].mxu0 %v13391_v7  ;;  %v4295_v53 = vpop.f32.mrb[14].mxu1  ;;  %11789 = vmatprep.subr.mxu1 %v2888_v32 }
 0x16f   : > { %11720 = vmatpush1.xpose.msra.mxu0 %v13396_v10  ;;  %v4297_v56 = vpop.f32.mrb[15].mxu1  ;;  %11714 = vmatmul.mubr.f32.vlgmr.msra.gmra.mrb[120].mxu1 %v13399_v11 }
 0x170   : > { %v4296_v57 = vadd.f32 %v4295_v53, %v4226_v51  ;;  %11783 = vmatprep.mubr.f32.mxu0 %v1479_v42  ;;  %11790 = vmatpush1.xpose.msra.mxu1 %v13404_v15 }
 0x171   : > { %v4365_v60 = vpop.f32.mrb[16].mxu0  ;;  %11859 = vmatprep.subr.mxu0 %v2904_v43  ;;  %11853 = vmatprep.mubr.f32.mxu1 %v1480_v48 }
 0x172   : > { %v4366_v0 = vadd.f32 %v4365_v60, %v4296_v57  ;;  %v4367_v1 = vpop.f32.mrb[17].mxu0  ;;  %11784 = vmatmul.mubr.f32.vlgmr.msra.gmra.mrb[122].mxu0 %v1471_v25  ;;  %v4435_v2 = vpop.f32.mrb[16].mxu1  ;;  %11929 = vmatprep.subr.mxu1 %v2905_v54 }
 0x173   : > { %11860 = vmatpush1.xpose.msra.mxu0 %v13414_v26  ;;  %v4437_v4 = vpop.f32.mrb[17].mxu1  ;;  %11854 = vmatmul.mubr.f32.vlgmr.msra.gmra.mrb[122].mxu1 %v1478_v33 }
 0x174   : > { %v4436_v5 = vadd.f32 %v4435_v2, %v4366_v0  ;;  %11923 = vmatprep.mubr.f32.mxu0 %v1496_v58  ;;  %11930 = vmatpush1.xpose.msra.mxu1 %v2903_v38 }
 0x175   : > { %v4505_v7 = vpop.f32.mrb[18].mxu0  ;;  %11999 = vmatprep.subr.mxu0 %v2921_v61  ;;  %11993 = vmatprep.mubr.f32.mxu1 %v1497_v62 }
 0x176   : > { %v4506_v9 = vadd.f32 %v4505_v7, %v4436_v5  ;;  %v4507_v14 = vpop.f32.mrb[19].mxu0  ;;  %11924 = vmatmul.mubr.f32.vlgmr.msra.gmra.mrb[124].mxu0 %v1488_v45  ;;  %v4575_v10 = vpop.f32.mrb[18].mxu1  ;;  %12069 = vmatprep.subr.mxu1 %v2922_v3 }
 0x177   : > { %12000 = vmatpush1.xpose.msra.mxu0 %v2913_v46  ;;  %v4577_v11 = vpop.f32.mrb[19].mxu1  ;;  %11994 = vmatmul.mubr.f32.vlgmr.msra.gmra.mrb[124].mxu1 %v1495_v49 }
 0x178   : > { %v4576_v12 = vadd.f32 %v4575_v10, %v4506_v9  ;;  %12063 = vmatprep.mubr.f32.mxu0 %v1513_v6  ;;  %12070 = vmatpush1.xpose.msra.mxu1 %v2920_v55 }
 0x179   : > { %v4645_v13 = vpop.f32.mrb[20].mxu0  ;;  %12133 = vmatprep.mubr.f32.mxu1 %v1514_v8 }
 0x17a   : > { %v4646_v15 = vadd.f32 %v4645_v13, %v4576_v12  ;;  %v4647_v16 = vpop.f32.mrb[21].mxu0  ;;  %12064 = vmatmul.mubr.f32.vlgmr.msra.gmra.mrb[126].mxu0 %v1505_v59  ;;  %v4715_v17 = vpop.f32.mrb[20].mxu1 }
 0x17b   : > { %v4717_v18 = vpop.f32.mrb[21].mxu1  ;;  %12134 = vmatmul.mubr.f32.vlgmr.msra.gmra.mrb[126].mxu1 %v1512_v63 }
 0x17c   : > { %v4716_v19 = vadd.f32 %v4715_v17, %v4646_v15 }
 0x17d   : > { %v4785_v20 = vpop.f32.mrb[22].mxu0 }
 0x17e   : > { %v4786_v21 = vadd.f32 %v4785_v20, %v4716_v19  ;;  %v4787_v22 = vpop.f32.mrb[23].mxu0  ;;  %v4855_v23 = vpop.f32.mrb[22].mxu1 }
 0x17f   : > { %v4857_v24 = vpop.f32.mrb[23].mxu1 }
 0x180   : > { %v4856_v25 = vadd.f32 %v4855_v23, %v4786_v21 }
 0x181   : > { %v4925_v26 = vpop.f32.mrb[24].mxu0 }
 0x182   : > { %v4926_v27 = vadd.f32 %v4925_v26, %v4856_v25  ;;  %v4927_v28 = vpop.f32.mrb[25].mxu0  ;;  %v4995_v29 = vpop.f32.mrb[24].mxu1 }
 0x183   : > { %v4997_v30 = vpop.f32.mrb[25].mxu1 }
 0x184   : > { %v4996_v31 = vadd.f32 %v4995_v29, %v4926_v27 }
 0x185   : > { %v5065_v32 = vpop.f32.mrb[26].mxu0 }
 0x186   : > { %v5066_v33 = vadd.f32 %v5065_v32, %v4996_v31  ;;  %v5067_v34 = vpop.f32.mrb[27].mxu0  ;;  %v5135_v35 = vpop.f32.mrb[26].mxu1 }
 0x187   : > { %v5137_v36 = vpop.f32.mrb[27].mxu1 }
 0x188   : > { %v5136_v37 = vadd.f32 %v5135_v35, %v5066_v33 }
 0x189   : > { %v5205_v38 = vpop.f32.mrb[28].mxu0 }
 0x18a   : > { %v5206_v39 = vadd.f32 %v5205_v38, %v5136_v37  ;;  %v5207_v40 = vpop.f32.mrb[29].mxu0  ;;  %v5275_v41 = vpop.f32.mrb[28].mxu1 }
 0x18b   : > { %v5277_v42 = vpop.f32.mrb[29].mxu1 }
 0x18c   : > { %v5276_v43 = vadd.f32 %v5275_v41, %v5206_v39 }
 0x18d   : > { %v5345_v44 = vpop.f32.mrb[30].mxu0 }
 0x18e   : > { %v5346_v45 = vadd.f32 %v5345_v44, %v5276_v43  ;;  %v5347_v46 = vpop.f32.mrb[31].mxu0  ;;  %v5415_v47 = vpop.f32.mrb[30].mxu1 }
 0x18f   : > { %v5417_v48 = vpop.f32.mrb[31].mxu1 }
 0x190   : > { %v5416_v49 = vadd.f32 %v5415_v47, %v5346_v45 }
 0x191   : > { %v5485_v50 = vpop.f32.mrb[32].mxu0 }
 0x192   : > { %v5486_v51 = vadd.f32 %v5485_v50, %v5416_v49  ;;  %v5487_v52 = vpop.f32.mrb[33].mxu0  ;;  %v5555_v53 = vpop.f32.mrb[32].mxu1 }
 0x193   : > { %v5557_v54 = vpop.f32.mrb[33].mxu1 }
 0x194   : > { %v5556_v55 = vadd.f32 %v5555_v53, %v5486_v51 }
 0x195   : > { %v5625_v56 = vpop.f32.mrb[34].mxu0 }
 0x196   : > { %v5626_v57 = vadd.f32 %v5625_v56, %v5556_v55  ;;  %v5627_v58 = vpop.f32.mrb[35].mxu0  ;;  %v5695_v59 = vpop.f32.mrb[34].mxu1 }
 0x197   : > { %v5697_v60 = vpop.f32.mrb[35].mxu1 }
 0x198   : > { %v5696_v61 = vadd.f32 %v5695_v59, %v5626_v57 }
 0x199   : > { %v5765_v62 = vpop.f32.mrb[36].mxu0 }
 0x19a   : > { %v5766_v63 = vadd.f32 %v5765_v62, %v5696_v61  ;;  %v5767_v0 = vpop.f32.mrb[37].mxu0  ;;  %v5835_v1 = vpop.f32.mrb[36].mxu1 }
 0x19b   : > { %v5837_v2 = vpop.f32.mrb[37].mxu1 }
 0x19c   : > { %v5836_v3 = vadd.f32 %v5835_v1, %v5766_v63 }
 0x19d   : > { %v5905_v4 = vpop.f32.mrb[38].mxu0 }
 0x19e   : > { %v5906_v5 = vadd.f32 %v5905_v4, %v5836_v3  ;;  %v5907_v6 = vpop.f32.mrb[39].mxu0  ;;  %v5975_v7 = vpop.f32.mrb[38].mxu1 }
 0x19f   : > { %v5977_v8 = vpop.f32.mrb[39].mxu1 }
 0x1a0   : > { %v5976_v9 = vadd.f32 %v5975_v7, %v5906_v5 }
 0x1a1   : > { %v6045_v14 = vpop.f32.mrb[40].mxu0 }
 0x1a2   : > { %v6046_v10 = vadd.f32 %v6045_v14, %v5976_v9  ;;  %v6047_v11 = vpop.f32.mrb[41].mxu0  ;;  %v6115_v12 = vpop.f32.mrb[40].mxu1 }
 0x1a3   : > { %v6117_v13 = vpop.f32.mrb[41].mxu1 }
 0x1a4   : > { %v6116_v15 = vadd.f32 %v6115_v12, %v6046_v10 }
 0x1a5   : > { %v6185_v16 = vpop.f32.mrb[42].mxu0 }
 0x1a6   : > { %v6186_v17 = vadd.f32 %v6185_v16, %v6116_v15  ;;  %v6187_v18 = vpop.f32.mrb[43].mxu0  ;;  %v6255_v19 = vpop.f32.mrb[42].mxu1 }
 0x1a7   : > { %v6257_v20 = vpop.f32.mrb[43].mxu1 }
 0x1a8   : > { %v6256_v21 = vadd.f32 %v6255_v19, %v6186_v17 }
 0x1a9   : > { %v6325_v22 = vpop.f32.mrb[44].mxu0 }
 0x1aa   : > { %v6326_v23 = vadd.f32 %v6325_v22, %v6256_v21  ;;  %v6327_v24 = vpop.f32.mrb[45].mxu0  ;;  %v6395_v25 = vpop.f32.mrb[44].mxu1 }
 0x1ab   : > { %v6397_v26 = vpop.f32.mrb[45].mxu1 }
 0x1ac   : > { %v6396_v27 = vadd.f32 %v6395_v25, %v6326_v23 }
 0x1ad   : > { %v6465_v28 = vpop.f32.mrb[46].mxu0 }
 0x1ae   : > { %v6466_v29 = vadd.f32 %v6465_v28, %v6396_v27  ;;  %v6467_v30 = vpop.f32.mrb[47].mxu0  ;;  %v6535_v31 = vpop.f32.mrb[46].mxu1 }
 0x1af   : > { %v6537_v32 = vpop.f32.mrb[47].mxu1 }
 0x1b0   : > { %v6536_v33 = vadd.f32 %v6535_v31, %v6466_v29 }
 0x1b1   : > { %v6605_v34 = vpop.f32.mrb[48].mxu0 }
 0x1b2   : > { %v6606_v35 = vadd.f32 %v6605_v34, %v6536_v33  ;;  %v6607_v36 = vpop.f32.mrb[49].mxu0  ;;  %v6675_v37 = vpop.f32.mrb[48].mxu1 }
 0x1b3   : > { %v6677_v38 = vpop.f32.mrb[49].mxu1 }
 0x1b4   : > { %v6676_v39 = vadd.f32 %v6675_v37, %v6606_v35 }
 0x1b5   : > { %v6745_v40 = vpop.f32.mrb[50].mxu0 }
 0x1b6   : > { %v6746_v41 = vadd.f32 %v6745_v40, %v6676_v39  ;;  %v6747_v42 = vpop.f32.mrb[51].mxu0  ;;  %v6815_v43 = vpop.f32.mrb[50].mxu1 }
 0x1b7   : > { %v6817_v44 = vpop.f32.mrb[51].mxu1 }
 0x1b8   : > { %v6816_v45 = vadd.f32 %v6815_v43, %v6746_v41 }
 0x1b9   : > { %v6885_v46 = vpop.f32.mrb[52].mxu0 }
 0x1ba   : > { %v6886_v47 = vadd.f32 %v6885_v46, %v6816_v45  ;;  %v6887_v48 = vpop.f32.mrb[53].mxu0  ;;  %v6955_v49 = vpop.f32.mrb[52].mxu1 }
 0x1bb   : > { %v6957_v50 = vpop.f32.mrb[53].mxu1 }
 0x1bc   : > { %v6956_v51 = vadd.f32 %v6955_v49, %v6886_v47 }
 0x1bd   : > { %v7025_v52 = vpop.f32.mrb[54].mxu0 }
 0x1be   : > { %v7026_v53 = vadd.f32 %v7025_v52, %v6956_v51  ;;  %v7027_v54 = vpop.f32.mrb[55].mxu0  ;;  %v7095_v55 = vpop.f32.mrb[54].mxu1 }
 0x1bf   : > { %v7097_v56 = vpop.f32.mrb[55].mxu1 }
 0x1c0   : > { %v7096_v57 = vadd.f32 %v7095_v55, %v7026_v53 }
 0x1c1   : > { %v7165_v58 = vpop.f32.mrb[56].mxu0 }
 0x1c2   : > { %v7166_v59 = vadd.f32 %v7165_v58, %v7096_v57  ;;  %v7167_v60 = vpop.f32.mrb[57].mxu0  ;;  %v7235_v61 = vpop.f32.mrb[56].mxu1 }
 0x1c3   : > { %v7237_v62 = vpop.f32.mrb[57].mxu1 }
 0x1c4   : > { %v7236_v63 = vadd.f32 %v7235_v61, %v7166_v59 }
 0x1c5   : > { %v7305_v0 = vpop.f32.mrb[58].mxu0 }
 0x1c6   : > { %v7306_v1 = vadd.f32 %v7305_v0, %v7236_v63  ;;  %v7307_v2 = vpop.f32.mrb[59].mxu0  ;;  %v7375_v3 = vpop.f32.mrb[58].mxu1 }
 0x1c7   : > { %v7377_v4 = vpop.f32.mrb[59].mxu1 }
 0x1c8   : > { %v7376_v5 = vadd.f32 %v7375_v3, %v7306_v1 }
 0x1c9   : > { %v7445_v6 = vpop.f32.mrb[60].mxu0 }
 0x1ca   : > { %v7446_v7 = vadd.f32 %v7445_v6, %v7376_v5  ;;  %v7447_v8 = vpop.f32.mrb[61].mxu0  ;;  %v7515_v9 = vpop.f32.mrb[60].mxu1 }
 0x1cb   : > { %v7517_v14 = vpop.f32.mrb[61].mxu1 }
 0x1cc   : > { %v7516_v10 = vadd.f32 %v7515_v9, %v7446_v7 }
 0x1cd   : > { %v7585_v11 = vpop.f32.mrb[62].mxu0 }
 0x1ce   : > { %v7586_v12 = vadd.f32 %v7585_v11, %v7516_v10  ;;  %v7587_v13 = vpop.f32.mrb[63].mxu0  ;;  %v7655_v15 = vpop.f32.mrb[62].mxu1 }
 0x1cf   : > { %v7657_v16 = vpop.f32.mrb[63].mxu1 }
 0x1d0   : > { %v7656_v17 = vadd.f32 %v7655_v15, %v7586_v12 }
 0x1d1   : > { %v7725_v18 = vpop.f32.mrb[64].mxu0 }
 0x1d2   : > { %v7726_v19 = vadd.f32 %v7725_v18, %v7656_v17  ;;  %v7727_v20 = vpop.f32.mrb[65].mxu0  ;;  %v7795_v21 = vpop.f32.mrb[64].mxu1 }
 0x1d3   : > { %v7797_v22 = vpop.f32.mrb[65].mxu1 }
 0x1d4   : > { %v7796_v23 = vadd.f32 %v7795_v21, %v7726_v19 }
 0x1d5   : > { %v7865_v24 = vpop.f32.mrb[66].mxu0 }
 0x1d6   : > { %v7866_v25 = vadd.f32 %v7865_v24, %v7796_v23  ;;  %v7867_v26 = vpop.f32.mrb[67].mxu0  ;;  %v7935_v27 = vpop.f32.mrb[66].mxu1 }
 0x1d7   : > { %v7937_v28 = vpop.f32.mrb[67].mxu1 }
 0x1d8   : > { %v7936_v29 = vadd.f32 %v7935_v27, %v7866_v25 }
 0x1d9   : > { %v8005_v30 = vpop.f32.mrb[68].mxu0 }
 0x1da   : > { %v8006_v31 = vadd.f32 %v8005_v30, %v7936_v29  ;;  %v8007_v32 = vpop.f32.mrb[69].mxu0  ;;  %v8075_v33 = vpop.f32.mrb[68].mxu1 }
 0x1db   : > { %v8077_v34 = vpop.f32.mrb[69].mxu1 }
 0x1dc   : > { %v8076_v35 = vadd.f32 %v8075_v33, %v8006_v31 }
 0x1dd   : > { %v8145_v36 = vpop.f32.mrb[70].mxu0 }
 0x1de   : > { %v8146_v37 = vadd.f32 %v8145_v36, %v8076_v35  ;;  %v8147_v38 = vpop.f32.mrb[71].mxu0  ;;  %v8215_v39 = vpop.f32.mrb[70].mxu1 }
 0x1df   : > { %v8217_v40 = vpop.f32.mrb[71].mxu1 }
 0x1e0   : > { %v8216_v41 = vadd.f32 %v8215_v39, %v8146_v37 }
 0x1e1   : > { %v8285_v42 = vpop.f32.mrb[72].mxu0 }
 0x1e2   : > { %v8286_v43 = vadd.f32 %v8285_v42, %v8216_v41  ;;  %v8287_v44 = vpop.f32.mrb[73].mxu0  ;;  %v8355_v45 = vpop.f32.mrb[72].mxu1 }
 0x1e3   : > { %v8357_v46 = vpop.f32.mrb[73].mxu1 }
 0x1e4   : > { %v8356_v47 = vadd.f32 %v8355_v45, %v8286_v43 }
 0x1e5   : > { %v8425_v48 = vpop.f32.mrb[74].mxu0 }
 0x1e6   : > { %v8426_v49 = vadd.f32 %v8425_v48, %v8356_v47  ;;  %v8427_v50 = vpop.f32.mrb[75].mxu0  ;;  %v8495_v51 = vpop.f32.mrb[74].mxu1 }
 0x1e7   : > { %v8497_v52 = vpop.f32.mrb[75].mxu1 }
 0x1e8   : > { %v8496_v53 = vadd.f32 %v8495_v51, %v8426_v49 }
 0x1e9   : > { %v8565_v54 = vpop.f32.mrb[76].mxu0 }
 0x1ea   : > { %v8566_v55 = vadd.f32 %v8565_v54, %v8496_v53  ;;  %v8567_v56 = vpop.f32.mrb[77].mxu0  ;;  %v8635_v57 = vpop.f32.mrb[76].mxu1 }
 0x1eb   : > { %v8637_v58 = vpop.f32.mrb[77].mxu1 }
 0x1ec   : > { %v8636_v59 = vadd.f32 %v8635_v57, %v8566_v55 }
 0x1ed   : > { %v8705_v60 = vpop.f32.mrb[78].mxu0 }
 0x1ee   : > { %v8706_v61 = vadd.f32 %v8705_v60, %v8636_v59  ;;  %v8707_v62 = vpop.f32.mrb[79].mxu0  ;;  %v8775_v63 = vpop.f32.mrb[78].mxu1 }
 0x1ef   : > { %v8777_v0 = vpop.f32.mrb[79].mxu1 }
 0x1f0   : > { %v8776_v1 = vadd.f32 %v8775_v63, %v8706_v61 }
 0x1f1   : > { %v8845_v2 = vpop.f32.mrb[80].mxu0 }
 0x1f2   : > { %v8846_v3 = vadd.f32 %v8845_v2, %v8776_v1  ;;  %v8847_v4 = vpop.f32.mrb[81].mxu0  ;;  %v8915_v5 = vpop.f32.mrb[80].mxu1 }
 0x1f3   : > { %v8917_v6 = vpop.f32.mrb[81].mxu1 }
 0x1f4   : > { %v8916_v7 = vadd.f32 %v8915_v5, %v8846_v3 }
 0x1f5   : > { %v8985_v8 = vpop.f32.mrb[82].mxu0 }
 0x1f6   : > { %v8986_v9 = vadd.f32 %v8985_v8, %v8916_v7  ;;  %v8987_v14 = vpop.f32.mrb[83].mxu0  ;;  %v9055_v10 = vpop.f32.mrb[82].mxu1 }
 0x1f7   : > { %v9057_v11 = vpop.f32.mrb[83].mxu1 }
 0x1f8   : > { %v9056_v12 = vadd.f32 %v9055_v10, %v8986_v9 }
 0x1f9   : > { %v9125_v13 = vpop.f32.mrb[84].mxu0 }
 0x1fa   : > { %v9126_v15 = vadd.f32 %v9125_v13, %v9056_v12  ;;  %v9127_v16 = vpop.f32.mrb[85].mxu0  ;;  %v9195_v17 = vpop.f32.mrb[84].mxu1 }
 0x1fb   : > { %v9197_v18 = vpop.f32.mrb[85].mxu1 }
 0x1fc   : > { %v9196_v19 = vadd.f32 %v9195_v17, %v9126_v15 }
 0x1fd   : > { %v9265_v20 = vpop.f32.mrb[86].mxu0 }
 0x1fe   : > { %v9266_v21 = vadd.f32 %v9265_v20, %v9196_v19  ;;  %v9267_v22 = vpop.f32.mrb[87].mxu0  ;;  %v9335_v23 = vpop.f32.mrb[86].mxu1 }
 0x1ff   : > { %v9337_v24 = vpop.f32.mrb[87].mxu1 }
 0x200   : > { %v9336_v25 = vadd.f32 %v9335_v23, %v9266_v21 }
 0x201   : > { %v9405_v26 = vpop.f32.mrb[88].mxu0 }
 0x202   : > { %v9406_v27 = vadd.f32 %v9405_v26, %v9336_v25  ;;  %v9407_v28 = vpop.f32.mrb[89].mxu0  ;;  %v9475_v29 = vpop.f32.mrb[88].mxu1 }
 0x203   : > { %v9477_v30 = vpop.f32.mrb[89].mxu1 }
 0x204   : > { %v9476_v31 = vadd.f32 %v9475_v29, %v9406_v27 }
 0x205   : > { %v9545_v32 = vpop.f32.mrb[90].mxu0 }
 0x206   : > { %v9546_v33 = vadd.f32 %v9545_v32, %v9476_v31  ;;  %v9547_v34 = vpop.f32.mrb[91].mxu0  ;;  %v9615_v35 = vpop.f32.mrb[90].mxu1 }
 0x207   : > { %v9617_v36 = vpop.f32.mrb[91].mxu1 }
 0x208   : > { %v9616_v37 = vadd.f32 %v9615_v35, %v9546_v33 }
 0x209   : > { %v9685_v38 = vpop.f32.mrb[92].mxu0 }
 0x20a   : > { %v9686_v39 = vadd.f32 %v9685_v38, %v9616_v37  ;;  %v9687_v40 = vpop.f32.mrb[93].mxu0  ;;  %v9755_v41 = vpop.f32.mrb[92].mxu1 }
 0x20b   : > { %v9757_v42 = vpop.f32.mrb[93].mxu1 }
 0x20c   : > { %v9756_v43 = vadd.f32 %v9755_v41, %v9686_v39 }
 0x20d   : > { %v9825_v44 = vpop.f32.mrb[94].mxu0 }
 0x20e   : > { %v9826_v45 = vadd.f32 %v9825_v44, %v9756_v43  ;;  %v9827_v46 = vpop.f32.mrb[95].mxu0  ;;  %v9895_v47 = vpop.f32.mrb[94].mxu1 }
 0x20f   : > { %v9897_v48 = vpop.f32.mrb[95].mxu1 }
 0x210   : > { %v9896_v49 = vadd.f32 %v9895_v47, %v9826_v45 }
 0x211   : > { %v9965_v50 = vpop.f32.mrb[96].mxu0 }
 0x212   : > { %v9966_v51 = vadd.f32 %v9965_v50, %v9896_v49  ;;  %v9967_v52 = vpop.f32.mrb[97].mxu0  ;;  %v10035_v53 = vpop.f32.mrb[96].mxu1 }
 0x213   : > { %v10037_v54 = vpop.f32.mrb[97].mxu1 }
 0x214   : > { %v10036_v55 = vadd.f32 %v10035_v53, %v9966_v51 }
 0x215   : > { %v10105_v56 = vpop.f32.mrb[98].mxu0 }
 0x216   : > { %v10106_v57 = vadd.f32 %v10105_v56, %v10036_v55  ;;  %v10107_v58 = vpop.f32.mrb[99].mxu0  ;;  %v10175_v59 = vpop.f32.mrb[98].mxu1 }
 0x217   : > { %v10177_v60 = vpop.f32.mrb[99].mxu1 }
 0x218   : > { %v10176_v61 = vadd.f32 %v10175_v59, %v10106_v57 }
 0x219   : > { %v10245_v62 = vpop.f32.mrb[100].mxu0 }
 0x21a   : > { %v10246_v63 = vadd.f32 %v10245_v62, %v10176_v61  ;;  %v10247_v0 = vpop.f32.mrb[101].mxu0  ;;  %v10315_v1 = vpop.f32.mrb[100].mxu1 }
 0x21b   : > { %v10317_v2 = vpop.f32.mrb[101].mxu1 }
 0x21c   : > { %v10316_v3 = vadd.f32 %v10315_v1, %v10246_v63 }
 0x21d   : > { %v10385_v4 = vpop.f32.mrb[102].mxu0 }
 0x21e   : > { %v10386_v5 = vadd.f32 %v10385_v4, %v10316_v3  ;;  %v10387_v6 = vpop.f32.mrb[103].mxu0  ;;  %v10455_v7 = vpop.f32.mrb[102].mxu1 }
 0x21f   : > { %v10457_v8 = vpop.f32.mrb[103].mxu1 }
 0x220   : > { %v10456_v9 = vadd.f32 %v10455_v7, %v10386_v5 }
 0x221   : > { %v10525_v14 = vpop.f32.mrb[104].mxu0 }
 0x222   : > { %v10526_v10 = vadd.f32 %v10525_v14, %v10456_v9  ;;  %v10527_v11 = vpop.f32.mrb[105].mxu0  ;;  %v10595_v12 = vpop.f32.mrb[104].mxu1 }
 0x223   : > { %v10597_v13 = vpop.f32.mrb[105].mxu1 }
 0x224   : > { %v10596_v15 = vadd.f32 %v10595_v12, %v10526_v10 }
 0x225   : > { %v10665_v16 = vpop.f32.mrb[106].mxu0 }
 0x226   : > { %v10666_v17 = vadd.f32 %v10665_v16, %v10596_v15  ;;  %v10667_v18 = vpop.f32.mrb[107].mxu0  ;;  %v10735_v19 = vpop.f32.mrb[106].mxu1  ;;  %v234_v16 = vld [vmem:[%s12947_s27] sm:$0x3] }
 0x227   : > { %v10737_v20 = vpop.f32.mrb[107].mxu1 }
 0x228   : > { %v10736_v21 = vadd.f32 %v10735_v19, %v10666_v17 }
 0x229   : > { %v10805_v22 = vpop.f32.mrb[108].mxu0 }
 0x22a   : > { %v10806_v23 = vadd.f32 %v10805_v22, %v10736_v21  ;;  %v10807_v24 = vpop.f32.mrb[109].mxu0  ;;  %v10875_v25 = vpop.f32.mrb[108].mxu1 }
 0x22b   : > { %v10877_v26 = vpop.f32.mrb[109].mxu1 }
 0x22c   : > { %v10876_v27 = vadd.f32 %v10875_v25, %v10806_v23 }
 0x22d   : > { %v10945_v28 = vpop.f32.mrb[110].mxu0 }
 0x22e   : > { %v10946_v29 = vadd.f32 %v10945_v28, %v10876_v27  ;;  %v10947_v30 = vpop.f32.mrb[111].mxu0  ;;  %v11015_v31 = vpop.f32.mrb[110].mxu1 }
 0x22f   : > { %v11017_v32 = vpop.f32.mrb[111].mxu1 }
 0x230   : > { %v11016_v33 = vadd.f32 %v11015_v31, %v10946_v29 }
 0x231   : > { %v11085_v34 = vpop.f32.mrb[112].mxu0 }
 0x232   : > { %v11086_v35 = vadd.f32 %v11085_v34, %v11016_v33  ;;  %v11087_v36 = vpop.f32.mrb[113].mxu0  ;;  %v11155_v37 = vpop.f32.mrb[112].mxu1 }
 0x233   : > { %v11157_v38 = vpop.f32.mrb[113].mxu1 }
 0x234   : > { %v11156_v39 = vadd.f32 %v11155_v37, %v11086_v35 }
 0x235   : > { %v11225_v40 = vpop.f32.mrb[114].mxu0 }
 0x236   : > { %v11226_v41 = vadd.f32 %v11225_v40, %v11156_v39  ;;  %v11227_v42 = vpop.f32.mrb[115].mxu0  ;;  %v11295_v43 = vpop.f32.mrb[114].mxu1 }
 0x237   : > { %v11297_v44 = vpop.f32.mrb[115].mxu1 }
 0x238   : > { %v11296_v45 = vadd.f32 %v11295_v43, %v11226_v41 }
 0x239   : > { %v11365_v46 = vpop.f32.mrb[116].mxu0 }
 0x23a   : > { %v11366_v47 = vadd.f32 %v11365_v46, %v11296_v45  ;;  %v11367_v48 = vpop.f32.mrb[117].mxu0  ;;  %v11435_v49 = vpop.f32.mrb[116].mxu1 }
 0x23b   : > { %v11437_v50 = vpop.f32.mrb[117].mxu1 }
 0x23c   : > { %v11436_v51 = vadd.f32 %v11435_v49, %v11366_v47 }
 0x23d   : > { %v11505_v52 = vpop.f32.mrb[118].mxu0 }
 0x23e   : > { %v11506_v53 = vadd.f32 %v11505_v52, %v11436_v51  ;;  %v11507_v54 = vpop.f32.mrb[119].mxu0  ;;  %v11575_v55 = vpop.f32.mrb[118].mxu1 }
 0x23f   : > { %v11577_v56 = vpop.f32.mrb[119].mxu1 }
 0x240   : > { %v11576_v57 = vadd.f32 %v11575_v55, %v11506_v53 }
 0x241   : > { %v11645_v58 = vpop.f32.mrb[120].mxu0 }
 0x242   : > { %v11646_v59 = vadd.f32 %v11645_v58, %v11576_v57  ;;  %v11647_v60 = vpop.f32.mrb[121].mxu0  ;;  %v11715_v61 = vpop.f32.mrb[120].mxu1 }
 0x243   : > { %v11717_v62 = vpop.f32.mrb[121].mxu1 }
 0x244   : > { %v11716_v63 = vadd.f32 %v11715_v61, %v11646_v59 }
 0x245   : > { %v11785_v0 = vpop.f32.mrb[122].mxu0 }
 0x246   : > { %v11786_v1 = vadd.f32 %v11785_v0, %v11716_v63  ;;  %v11787_v2 = vpop.f32.mrb[123].mxu0  ;;  %v11855_v3 = vpop.f32.mrb[122].mxu1 }
 0x247   : > { %v11857_v4 = vpop.f32.mrb[123].mxu1 }
 0x248   : > { %v11856_v5 = vadd.f32 %v11855_v3, %v11786_v1 }
 0x249   : > { %v11925_v6 = vpop.f32.mrb[124].mxu0 }
 0x24a   : > { %v11926_v7 = vadd.f32 %v11925_v6, %v11856_v5  ;;  %v11927_v8 = vpop.f32.mrb[125].mxu0  ;;  %v11995_v9 = vpop.f32.mrb[124].mxu1 }
 0x24b   : > { %v11997_v14 = vpop.f32.mrb[125].mxu1 }
 0x24c   : > { %v11996_v10 = vadd.f32 %v11995_v9, %v11926_v7 }
 0x24d   : > { %v12065_v11 = vpop.f32.mrb[126].mxu0 }
 0x24e   : > { %v12066_v12 = vadd.f32 %v12065_v11, %v11996_v10  ;;  %v12067_v13 = vpop.f32.mrb[127].mxu0  ;;  %v12135_v15 = vpop.f32.mrb[126].mxu1 }
 0x24f   : > { %v12137_v17 = vpop.f32.mrb[127].mxu1 }
 0x250   : > { %v12136_v18 = vadd.f32 %v12135_v15, %v12066_v12 }
 0x252   : > { %v12139_v19 = vadd.f32 %v12136_v18, %v234_v16 }
 0x254   : > { %12141 = vst.msk [vmem:[%s12947_s27] sm:$0x3] %vm12140_vm1, %v12139_v19 }
 0x255   : > { %12601 = shalt.err (!%p12598_p12)
}
 0x256   : > { %s12602_s22 = scalar_lea.hbm %s13448_s21, 32  ;;  %s12606_s5 = scalar_lea.hbm %s13515_s2, 64 }
 0x257   : > { %p12603_p2 = scmp.ne.s32.totalorder %s13448_s21, %s12602_s22  ;;  %p12607_p1 = scmp.lt.u32.totalorder %s13448_s21, %s13515_s2 }
 0x258   : > { %p12608_p9 = scmp.lt.u32.totalorder %s12606_s5, %s12602_s22  ;;  %p12610_p3 = scmp.lt.u32.totalorder %s12602_s22, %s13448_s21 }
 0x259   : > { %p12604_p8 = pnand %p12603_p2, %p13538_p11 }
 0x25a   : > { %p12609_p7 = por %p12608_p9, %p12607_p1 }
 0x25b   : > { %p12605_p10 = pneg %p12604_p8 }
 0x25c   : > { %p12611_p5 = por %p12610_p3, %p12609_p7 }
 0x25e   : > { %p12612_p13 = pnand %p12611_p5, %p12605_p10 }
 0x260   : > { %12615 = shalt.err (!%p12612_p13)
}
 0x261   : > { %12295 = dma.vmem_to_hbm [thread:$0]  (%p13538_p11), %s13450_s28, 32, %s13448_s21, %s12143_s23  }
 0x262 PF: > { %p12309_p0 = scmp.ge.s32.totalorder %s12714_s19, 2  ;;  %s12168_s27 = sand.u32 1, %s12674_s9  }
 0x263   : > { %p13539_p4 = scmp.ne.s32.totalorder %s13528_s20, 0  ;;  %s12169_s15 = scalar_lea.sflag [#allocation4], %s12168_s27 }
 0x265   : > { %p12305_p6 = pnand %p12309_p0, %p13539_p4 }
 0x267   : > { %12669 = dma.done.wait (!%p12305_p6), %s12169_s15, 32  }
 0x268   : > { %12671 = vsyncadd (!%p12305_p6), %s12169_s15, 4294967264  ;;  %s21_s19 = sadd.s32 1, %s12714_s19   ;;  %s13540_s8 = sld [smem:[#allocation11_spill]] }
 0x269   : > { %p18_p12 = scmp.ge.s32.totalorder %s21_s19, 10   ;;  %s13541_s28 = sld [smem:[#allocation12_spill]] }
 0x26a   : > { %s13542_s9 = smov %s12678_s10  ;;  %s13543_s10 = smov %s12682_s11 }
 0x26b   : > { %s13544_s11 = smov %s12824_s6  ;;  %s13545_s12 = smov %s12690_s13 }
 0x26c   : > { %s13546_s13 = smov %s12694_s14  ;;  %s13547_s14 = smov %s12827_s7 }
 0x26d   : > { %s13548_s15 = smov %s12706_s17  ;;  %s13549_s16 = smov %s12710_s18 }
 0x26e   : > { %s13550_s17 = smov %s13540_s8  ;;  %20 = sbr.rel (!%p18_p12) target bundleno = 13 (0xd), region = 90 }
 0x26f   : > { %s13551_s18 = smov %s13541_s28 }
 0x275   :  { %12174 = vsyncpa [#allocation3], 1 }
 0x276   :  { %12176 = vsyncpa [#allocation3 + $0x1], 1 }
 0x277   :  { %12177 = vsyncpa [#allocation6], 1 }
 0x278   :  { %12179 = vsyncpa [#allocation6 + $0x1], 1 }
 0x279   :  { %12180 = vsyncpa [#allocation4], 1 }
 0x27a   :  { %12182 = vsyncpa [#allocation4 + $0x1], 1 }

</bundles_post_ra>
